<compile_context>
chip_gen: v7x
topology: tpu7x:2x2x1
jax: 0.10.0
libtpu: 0.0.40
codegen_flags: <defaults>
</compile_context>

<pallas_src>
import functools

import jax
import jax.numpy as jnp
import numpy as np
from jax.experimental import pallas as pl
from jax.experimental.pallas import tpu as pltpu


# ----------------------------------------------------------------------------
# Shared conv helper: 3x3 "same" conv on a row-aligned window of the padded,
# flattened activation (noise map folded in as the last input channel).
# ----------------------------------------------------------------------------
def _conv3x3_window(xw, w_ref, *, W, TP):
    """xw: (TP + 2*W + 2, Cin1) bf16 window of the H-padded, flattened input,
    starting at a flat offset that is a multiple of W.  w_ref: (3, 3*Cin1, tc)
    per-dy weight slabs, K ordered [dx=0 | dx=1 | dx=2].  Returns (TP, tc) f32."""
    win = xw.shape[0]
    # Column (within a row of width W) of each window element.  The W axis is
    # not zero padded, so flat-row shifts wrap across rows and the wrapped
    # columns must be masked.  Two pre-masked copies replace six per-tap selects.
    col = (jax.lax.broadcasted_iota(jnp.int32, (win, 1), 0) - 1) % W
    zero = jnp.zeros_like(xw)
    x_nolast = jnp.where(col == W - 1, zero, xw)     # source for all dx == 0 taps
    x_nofirst = jnp.where(col == 0, zero, xw)        # source for all dx == 2 taps

    acc = jnp.zeros((TP, w_ref.shape[-1]), jnp.float32)
    for dy in range(3):
        s = dy * W
        # Merge the three dx taps into one K = 3*Cin1 MXU matmul per dy.
        xcat = jnp.concatenate(
            [x_nolast[s:s + TP],
             xw[s + 1:s + 1 + TP],
             x_nofirst[s + 2:s + 2 + TP]], axis=1)   # (TP, 3*Cin1) bf16
        acc = acc + jnp.dot(xcat, w_ref[dy], preferred_element_type=jnp.float32)
    return acc


# ----------------------------------------------------------------------------
# Fused whole-image stage kernel (small/medium spatial extents).
# ----------------------------------------------------------------------------
def _stage_fused_kernel(x_ref, vec_ref, w_ref, out_ref, *, H, W):
    HW = H * W
    acc = _conv3x3_window(x_ref[0], w_ref, W=W, TP=HW)        # (HW, tc) f32
    vec = vec_ref[0]                                          # (3, tc): bias, ss, sb
    act = acc + vec[0:1, :]
    act = jnp.maximum(act, 0.2 * act)                         # LeakyReLU(0.2)

    # InstanceNorm2d (affine=False, eps=1e-5), two-pass stats; AdaIN folded into
    # a single scale/shift pass.
    # TODO(synk): the per-channel sums could be pushed onto the MXU
    # (ones(8, HW) @ act) to free VALU slots in the small-Cin layers.
    inv_hw = 1.0 / HW
    mean = jnp.sum(act, axis=0, keepdims=True) * inv_hw
    cen = act - mean
    var = jnp.sum(cen * cen, axis=0, keepdims=True) * inv_hw
    scale = vec[1:2, :] * jax.lax.rsqrt(var + 1e-5)
    out_ref[0] = (cen * scale + vec[2:3, :]).astype(out_ref.dtype)


# ----------------------------------------------------------------------------
# HW-tiled path: streaming conv+stats kernel, then a tiny apply kernel.
# ----------------------------------------------------------------------------
def _conv_stats_kernel(x_ref, vec_ref, w_ref, act_ref, stats_ref, *, W, TP):
    j = pl.program_id(2)
    win = TP + 2 * W + 2
    p0 = pl.multiple_of(j * TP, TP)
    xw = x_ref[0, pl.ds(p0, win), :]                          # (win, Cin1) bf16
    acc = _conv3x3_window(xw, w_ref, W=W, TP=TP)              # (TP, tc) f32
    act = acc + vec_ref[0, 0:1, :]
    act = jnp.maximum(act, 0.2 * act)
    act_ref[0] = act.astype(act_ref.dtype)                    # un-normalised, bf16

    # Streaming per-channel sum / sum-of-squares (resident accumulator output).
    @pl.when(j == 0)
    def _():
        stats_ref[...] = jnp.zeros_like(stats_ref)

    stats_ref[0, 0:1, :] += jnp.sum(act, axis=0, keepdims=True)
    stats_ref[0, 1:2, :] += jnp.sum(act * act, axis=0, keepdims=True)


def _apply_kernel(act_ref, sc_ref, out_ref):
    sc = sc_ref[0]                                            # (2, tc): scale, shift
    a = act_ref[0].astype(jnp.float32)
    out_ref[0] = (a * sc[0:1, :] + sc[1:2, :]).astype(out_ref.dtype)


# ----------------------------------------------------------------------------
# Host-side glue.
# ----------------------------------------------------------------------------
def _pick_cout_tile(cout):
    # 128 is lane-dense and MXU-friendly on all generations (v5e MXUs are
    # 128-wide; the VMEM saving vs 256 also matters most on v5e).
    return 128 if cout % 128 == 0 else cout


def _pick_tile_rows(H, W):
    # ~4K output pixels per HW tile keeps the f32 accumulator tile small while
    # amortising per-step overhead; tiles are whole rows and must keep the
    # (th*W) block dim 8-divisible.
    target = max(1, 4096 // W)
    best = H
    for d in range(1, H + 1):
        if H % d == 0 and d <= target and (d * W) % 8 == 0:
            best = d
    return best


def _vmem_limit_bytes():
    try:
        cap = int(pltpu.get_tpu_info().vmem_capacity_bytes)
    except Exception:
        cap = 64 * 1024 * 1024
    # ~50 MiB on v7x (64 MiB physical), capped at 100 MiB on v5e/v6e (128 MiB).
    return min(100 * 1024 * 1024, int(cap * 0.78))


def _fused_vmem_estimate(R, Cin1, HW, tc, out_itemsize):
    x = R * Cin1 * 2
    w = 9 * Cin1 * tc * 2
    o = HW * tc * out_itemsize
    acc = 2 * HW * tc * 4                 # conv accumulator + activation (f32)
    xcat = HW * 3 * Cin1 * 2              # merged-K activation slab (bf16)
    masked = 2 * R * Cin1 * 2             # pre-masked activation copies (bf16)
    return 2 * (x + w + o) + acc + xcat + masked


def _prep_input(x_nhwc, noise):
    """Append the noise map as an extra channel, pad H by one row each side,
    flatten spatial, and add one zero pixel at each end -- one bf16 buffer."""
    B, H, W, Cin = x_nhwc.shape
    HW = H * W
    R = (H + 2) * W + 2
    xa = jnp.concatenate(
        [x_nhwc.astype(jnp.bfloat16),
         noise.reshape(B, H, W, 1).astype(jnp.bfloat16)], axis=-1)
    xf = jnp.zeros((B, R, Cin + 1), jnp.bfloat16)
    return jax.lax.dynamic_update_slice(xf, xa.reshape(B, HW, Cin + 1),
                                        (0, W + 1, 0))


def _make_vecs(w, p):
    """Per-sample fused (B, 3, Cout) vectors: [conv_bias, adain_scale, adain_shift].
    The two WSLinear style projections are hoisted into one batched XLA matmul."""
    B = w.shape[0]
    cout = p["conv_b"].shape[-1]
    ss = w @ p["ss_w"] + p["ss_b"]
    sb = w @ p["sb_w"] + p["sb_b"]
    cb = jnp.broadcast_to(p["conv_b"], (B, cout))
    return jnp.stack([cb, ss, sb], axis=1).astype(jnp.float32)


def _stage_fused(xf, vecs, w_slab, *, B, H, W, Cout, tc, out_dtype, vmem_limit):
    HW = H * W
    Cin1 = xf.shape[-1]
    R = (H + 2) * W + 2
    n_ct = Cout // tc

    # Grid order: weight-heavy layers (early GenBlocks: big Cin/Cout, small
    # spatial) keep the weight slab resident across the batch; otherwise the
    # activation stays resident across Cout tiles.
    w_bytes = 9 * Cin1 * Cout * 2
    x_bytes = R * Cin1 * 2
    weight_heavy = (B - 1) * w_bytes > (n_ct - 1) * x_bytes
    if weight_heavy:
        grid = (n_ct, B)
        x_map = lambda c, b: (b, 0, 0)
        v_map = lambda c, b: (b, 0, c)
        w_map = lambda c, b: (0, 0, c)
        o_map = lambda c, b: (b, 0, c)
    else:
        grid = (B, n_ct)
        x_map = lambda b, c: (b, 0, 0)
        v_map = lambda b, c: (b, 0, c)
        w_map = lambda b, c: (0, 0, c)
        o_map = lambda b, c: (b, 0, c)

    kern = functools.partial(_stage_fused_kernel, H=H, W=W)
    return pl.pallas_call(
        kern,
        out_shape=jax.ShapeDtypeStruct((B, HW, Cout), out_dtype),
        grid=grid,
        in_specs=[
            pl.BlockSpec((1, R, Cin1), x_map),            # padded flat x+noise (bf16)
            pl.BlockSpec((1, 3, tc), v_map),              # per-sample fused vectors
            pl.BlockSpec((3, 3 * Cin1, tc), w_map),       # per-dy weight slabs (bf16)
        ],
        out_specs=pl.BlockSpec((1, HW, tc), o_map),
        compiler_params=pltpu.CompilerParams(
            dimension_semantics=("parallel", "parallel"),
            vmem_limit_bytes=vmem_limit),
    )(xf, vecs, w_slab)


def _stage_tiled(xf, vecs, w_slab, *, B, H, W, Cout, tc, out_dtype, vmem_limit,
                 tile_rows=None):
    HW = H * W
    Cin1 = xf.shape[-1]
    R = (H + 2) * W + 2
    n_ct = Cout // tc
    th = tile_rows if tile_rows is not None else _pick_tile_rows(H, W)
    assert H % th == 0 and ((th * W) % 8 == 0 or th == H)
    TP = th * W
    n_hw = HW // TP

    # Pass 1: conv + noise + bias + LeakyReLU streamed over HW row tiles,
    # emitting the un-normalised activation (bf16) plus per-channel sum/sum^2.
    # Grid order (ct, b, hw): the weight slab stays resident across batch and
    # HW; the large-spatial layers have Cout <= 128 so n_ct == 1 and x is not
    # re-read across Cout tiles.
    kern = functools.partial(_conv_stats_kernel, W=W, TP=TP)
    act, stats = pl.pallas_call(
        kern,
        out_shape=(jax.ShapeDtypeStruct((B, HW, Cout), jnp.bfloat16),
                   jax.ShapeDtypeStruct((B, 2, Cout), jnp.float32)),
        grid=(n_ct, B, n_hw),
        in_specs=[
            pl.BlockSpec((1, R, Cin1), lambda c, b, j: (b, 0, 0)),
            pl.BlockSpec((1, 3, tc), lambda c, b, j: (b, 0, c)),
            pl.BlockSpec((3, 3 * Cin1, tc), lambda c, b, j: (0, 0, c)),
        ],
        out_specs=(pl.BlockSpec((1, TP, tc), lambda c, b, j: (b, j, c)),
                   pl.BlockSpec((1, 2, tc), lambda c, b, j: (b, 0, c))),
        compiler_params=pltpu.CompilerParams(
            dimension_semantics=("parallel", "parallel", "arbitrary"),
            vmem_limit_bytes=vmem_limit),
    )(xf, vecs, w_slab)

    # Tiny per-(sample, channel) fold of the streamed stats into scale/shift.
    # NOTE: one-pass variance (E[x^2] - E[x]^2) in f32, guarded against
    # cancellation going negative.
    inv_hw = 1.0 / HW
    mean = stats[:, 0, :] * inv_hw
    var = jnp.maximum(stats[:, 1, :] * inv_hw - mean * mean, 0.0)
    scale = vecs[:, 1, :] * jax.lax.rsqrt(var + 1e-5)
    shift = vecs[:, 2, :] - mean * scale
    scsh = jnp.stack([scale, shift], axis=1)                  # (B, 2, Cout) f32

    # Pass 2: apply normalisation + AdaIN, streamed over the same tiles.
    return pl.pallas_call(
        _apply_kernel,
        out_shape=jax.ShapeDtypeStruct((B, HW, Cout), out_dtype),
        grid=(n_ct, B, n_hw),
        in_specs=[pl.BlockSpec((1, TP, tc), lambda c, b, j: (b, j, c)),
                  pl.BlockSpec((1, 2, tc), lambda c, b, j: (b, 0, c))],
        out_specs=pl.BlockSpec((1, TP, tc), lambda c, b, j: (b, j, c)),
        compiler_params=pltpu.CompilerParams(
            dimension_semantics=("parallel", "parallel", "parallel"),
            vmem_limit_bytes=vmem_limit),
    )(act, scsh)


def _stage(x_nhwc, noise, vecs, w_slab, *, out_dtype, force_tiled=False,
           tile_rows=None):
    B, H, W, Cin = x_nhwc.shape
    Cout = w_slab.shape[-1]
    HW = H * W
    R = (H + 2) * W + 2
    xf = _prep_input(x_nhwc, noise)
    tc = _pick_cout_tile(Cout)
    vmem_limit = _vmem_limit_bytes()
    fused_bytes = _fused_vmem_estimate(R, Cin + 1, HW, tc,
                                       np.dtype(out_dtype).itemsize)
    if force_tiled or fused_bytes > int(0.6 * vmem_limit):
        out = _stage_tiled(xf, vecs, w_slab, B=B, H=H, W=W, Cout=Cout, tc=tc,
                           out_dtype=out_dtype, vmem_limit=vmem_limit,
                           tile_rows=tile_rows)
    else:
        out = _stage_fused(xf, vecs, w_slab, B=B, H=H, W=W, Cout=Cout, tc=tc,
                           out_dtype=out_dtype, vmem_limit=vmem_limit)
    return out.reshape(B, H, W, Cout)


# ----------------------------------------------------------------------------
# Parameter construction (PyTorch-equivalent semantics, Pallas-friendly layout).
# ----------------------------------------------------------------------------
def init_genblock_params(key, in_channels, out_channels, w_dim):
    keys = jax.random.split(key, 14)

    def ws_conv_slab(kw, cin, cout, noise_w):
        # torch WSConv2d: conv(x * sqrt(2/(cin*9))) + bias; the scale is folded
        # into the weight.  The AddNoise weight is folded in as one extra K row
        # of the centre tap (dy=1, dx=1) acting on the appended noise channel.
        # TODO(synk): if noise_w is trained separately, rebuild this slab.
        w = jax.random.normal(kw, (cout, cin, 3, 3), jnp.float32)
        taps = jnp.transpose(w, (2, 3, 1, 0)) * np.sqrt(2.0 / (cin * 9))
        nrows = jnp.zeros((3, 3, 1, cout), jnp.float32).at[1, 1, 0, :].set(noise_w)
        slab = jnp.concatenate([taps, nrows], axis=2)          # (3, 3, cin+1, cout)
        return slab.reshape(3, 3 * (cin + 1), cout).astype(jnp.bfloat16)

    def ws_linear(kw, kb, cin, cout):
        # torch WSLinear: linear(x * sqrt(2/cin)) + bias; scale folded into W.
        w = jax.random.normal(kw, (cout, cin), jnp.float32)
        b = 0.1 * jax.random.normal(kb, (cout,), jnp.float32)
        return jnp.transpose(w) * np.sqrt(2.0 / cin), b

    def stage(ks, cin, cout):
        cb = 0.1 * jax.random.normal(ks[1], (cout,), jnp.float32)
        # torch AddNoise weight starts at zeros; small nonzero values here so
        # the noise path is numerically exercised by the test.
        nw = 0.1 * jax.random.normal(ks[2], (cout,), jnp.float32)
        cw = ws_conv_slab(ks[0], cin, cout, nw)
        ssw, ssb = ws_linear(ks[3], ks[4], w_dim, cout)
        sbw, sbb = ws_linear(ks[5], ks[6], w_dim, cout)
        return dict(conv_w=cw, conv_b=cb, ss_w=ssw, ss_b=ssb, sb_w=sbw, sb_b=sbb)

    return dict(stage1=stage(keys[0:7], in_channels, out_channels),
                stage2=stage(keys[7:14], out_channels, out_channels))


def genblock_forward(x_nchw, w, noise1, noise2, params, *, force_tiled=False,
                     tile_rows=None):
    x = jnp.transpose(x_nchw, (0, 2, 3, 1))                    # NCHW -> NHWC
    vecs1 = _make_vecs(w, params["stage1"])
    vecs2 = _make_vecs(w, params["stage2"])
    # Stage-1 output stays bf16: it feeds stage 2's bf16 MXU path directly.
    h1 = _stage(x, noise1, vecs1, params["stage1"]["conv_w"],
                out_dtype=jnp.bfloat16, force_tiled=force_tiled,
                tile_rows=tile_rows)
    h2 = _stage(h1, noise2, vecs2, params["stage2"]["conv_w"],
                out_dtype=jnp.float32, force_tiled=force_tiled,
                tile_rows=tile_rows)
    return jnp.transpose(h2, (0, 3, 1, 2))                     # NHWC -> NCHW


# ----------------------------------------------------------------------------
# Pure-JAX reference (same math, same bf16 matmul precision) for correctness.
# ----------------------------------------------------------------------------
def _stage_ref(x_nhwc, noise, vecs, conv_w_slab, out_dtype):
    B, H, W, Cin = x_nhwc.shape
    Cin1 = Cin + 1
    Cout = conv_w_slab.shape[-1]
    taps = conv_w_slab.reshape(3, 3, Cin1, Cout)               # bf16
    xa = jnp.concatenate(
        [x_nhwc.astype(jnp.bfloat16),
         noise.reshape(B, H, W, 1).astype(jnp.bfloat16)], axis=-1)
    xp = jnp.pad(xa, ((0, 0), (1, 1), (1, 1), (0, 0)))
    conv = jnp.zeros((B, H, W, Cout), jnp.float32)
    for dy in range(3):
        for dx in range(3):
            xs = xp[:, dy:dy + H, dx:dx + W, :]
            conv = conv + jnp.einsum("bhwc,cd->bhwd", xs, taps[dy, dx],
                                     preferred_element_type=jnp.float32)
    bias = vecs[:, 0][:, None, None, :]
    ss = vecs[:, 1][:, None, None, :]
    sb = vecs[:, 2][:, None, None, :]
    act = conv + bias
    act = jnp.maximum(act, 0.2 * act)
    mean = jnp.mean(act, axis=(1, 2), keepdims=True)
    var = jnp.mean((act - mean) ** 2, axis=(1, 2), keepdims=True)
    normed = (act - mean) * jax.lax.rsqrt(var + 1e-5)
    return (ss * normed + sb).astype(out_dtype)


def genblock_ref(x_nchw, w, noise1, noise2, params):
    x = jnp.transpose(x_nchw, (0, 2, 3, 1))
    vecs1 = _make_vecs(w, params["stage1"])
    vecs2 = _make_vecs(w, params["stage2"])
    h1 = _stage_ref(x, noise1, vecs1, params["stage1"]["conv_w"], jnp.bfloat16)
    h2 = _stage_ref(h1, noise2, vecs2, params["stage2"]["conv_w"], jnp.float32)
    return jnp.transpose(h2, (0, 3, 1, 2))


if __name__ == "__main__":
    B, Cin, Cout, H, W, Wdim = 2, 4, 8, 16, 16, 8

    key = jax.random.PRNGKey(0)
    k_params, k_x, k_w, k_n1, k_n2 = jax.random.split(key, 5)

    params = init_genblock_params(k_params, Cin, Cout, Wdim)
    x = jax.random.normal(k_x, (B, Cin, H, W), jnp.float32)    # NCHW like PyTorch
    w_lat = jax.random.normal(k_w, (B, Wdim), jnp.float32)
    # AddNoise draws fresh torch.randn((B,1,H,W)) per forward; the equivalent is
    # drawn deterministically host-side so kernel and reference match.
    noise1 = jax.random.normal(k_n1, (B, H, W), jnp.float32)
    noise2 = jax.random.normal(k_n2, (B, H, W), jnp.float32)

    ref = genblock_ref(x, w_lat, noise1, noise2, params)

    # Fused whole-image path (auto-selected at this small shape).
    out = jax.block_until_ready(genblock_forward(x, w_lat, noise1, noise2, params))
    assert out.shape == (B, Cout, H, W)
    np.testing.assert_allclose(np.asarray(out), np.asarray(ref),
                               atol=2e-2, rtol=2e-2)

    # HW-tiled streaming-stats path, forced at a small shape (4 row-tiles) so the
    # large-spatial code path is exercised too.
    out_t = jax.block_until_ready(
        genblock_forward(x, w_lat, noise1, noise2, params,
                         force_tiled=True, tile_rows=4))
    np.testing.assert_allclose(np.asarray(out_t), np.asarray(ref),
                               atol=3e-2, rtol=3e-2)

    print("KERNEL_OK")
</pallas_src>

<mosaic_0001>
module attributes {stable_mosaic.version = 11 : i64} {
  func.func @_stage_fused_kernel(%arg0: i32, %arg1: i32, %arg2: memref<1x290x5xbf16, #tpu.memory_space<vmem>>, %arg3: memref<1x3x8xf32, #tpu.memory_space<vmem>>, %arg4: memref<3x15x8xbf16, #tpu.memory_space<vmem>>, %arg5: memref<1x256x8xbf16, #tpu.memory_space<vmem>>) attributes {dimension_semantics = [#tpu.dimension_semantics<parallel>, #tpu.dimension_semantics<parallel>], iteration_bounds = array<i64: 1, 2>, scalar_prefetch = 0 : i64, scratch_operands = 0 : i64, tpu.core_type = #tpu.core_type<tc>, window_params = [{transform_indices = @transform_0, window_bounds = array<i64: 1, 290, 5>}, {transform_indices = @transform_1, window_bounds = array<i64: 1, 3, 8>}, {transform_indices = @transform_2, window_bounds = array<i64: 3, 15, 8>}, {transform_indices = @transform_3, window_bounds = array<i64: 1, 256, 8>}]} {
    %c0 = arith.constant 0 : index
    %c0_0 = arith.constant 0 : index
    %c0_1 = arith.constant 0 : index
    %0 = vector.load %arg2[%c0, %c0_0, %c0_1] : memref<1x290x5xbf16, #tpu.memory_space<vmem>>, vector<1x290x5xbf16>
    %1 = vector.shape_cast %0 : vector<1x290x5xbf16> to vector<290x5xbf16>
    %2 = tpu.iota {dimensions = array<i32: 0>} : vector<290x1xi32>
    %c1_i32 = arith.constant 1 : i32
    %3 = vector.broadcast %c1_i32 : i32 to vector<290x1xi32>
    %4 = arith.subi %2, %3 : vector<290x1xi32>
    %c16_i32 = arith.constant 16 : i32
    %c0_i32 = arith.constant 0 : i32
    %5 = arith.cmpi eq, %c16_i32, %c0_i32 : i32
    %c1_i32_2 = arith.constant 1 : i32
    %6 = arith.select %5, %c1_i32_2, %c16_i32 : i32
    %7 = vector.broadcast %6 : i32 to vector<290x1xi32>
    %8 = arith.remsi %4, %7 : vector<290x1xi32>
    %c0_i32_3 = arith.constant 0 : i32
    %9 = vector.broadcast %c0_i32_3 : i32 to vector<290x1xi32>
    %10 = arith.cmpi ne, %8, %9 : vector<290x1xi32>
    %c0_i32_4 = arith.constant 0 : i32
    %11 = vector.broadcast %c0_i32_4 : i32 to vector<290x1xi32>
    %12 = arith.cmpi slt, %8, %11 : vector<290x1xi32>
    %c0_i32_5 = arith.constant 0 : i32
    %13 = arith.cmpi slt, %6, %c0_i32_5 : i32
    %14 = vector.broadcast %13 : i1 to vector<290x1xi1>
    %15 = vector.broadcast %14 : vector<290x1xi1> to vector<290x1xi1>
    %16 = arith.xori %12, %15 : vector<290x1xi1>
    %17 = arith.andi %16, %10 : vector<290x1xi1>
    %18 = vector.broadcast %6 : i32 to vector<290x1xi32>
    %19 = arith.addi %8, %18 : vector<290x1xi32>
    %20 = arith.select %17, %19, %8 : vector<290x1xi1>, vector<290x1xi32>
    %cst = arith.constant 0.000000e+00 : bf16
    %21 = vector.broadcast %cst : bf16 to vector<290x5xbf16>
    %c15_i32 = arith.constant 15 : i32
    %22 = vector.broadcast %c15_i32 : i32 to vector<290x1xi32>
    %23 = arith.cmpi eq, %20, %22 : vector<290x1xi32>
    %24 = vector.shape_cast %23 : vector<290x1xi1> to vector<290x1xi1>
    %25 = vector.broadcast %24 : vector<290x1xi1> to vector<290x5xi1>
    %26 = arith.select %25, %21, %1 : vector<290x5xi1>, vector<290x5xbf16>
    %c0_i32_6 = arith.constant 0 : i32
    %27 = vector.broadcast %c0_i32_6 : i32 to vector<290x1xi32>
    %28 = arith.cmpi eq, %20, %27 : vector<290x1xi32>
    %29 = vector.shape_cast %28 : vector<290x1xi1> to vector<290x1xi1>
    %30 = vector.broadcast %29 : vector<290x1xi1> to vector<290x5xi1>
    %31 = arith.select %30, %21, %1 : vector<290x5xi1>, vector<290x5xbf16>
    %cst_7 = arith.constant 0.000000e+00 : f32
    %32 = vector.broadcast %cst_7 : f32 to vector<256x8xf32>
    %33 = vector.extract_strided_slice %26 {offsets = [0, 0], sizes = [256, 5], strides = [1, 1]} : vector<290x5xbf16> to vector<256x5xbf16>
    %34 = vector.extract_strided_slice %1 {offsets = [1, 0], sizes = [256, 5], strides = [1, 1]} : vector<290x5xbf16> to vector<256x5xbf16>
    %35 = vector.extract_strided_slice %31 {offsets = [2, 0], sizes = [256, 5], strides = [1, 1]} : vector<290x5xbf16> to vector<256x5xbf16>
    %36 = tpu.concatenate %33, %34, %35 in 1 : vector<256x5xbf16>, vector<256x5xbf16>, vector<256x5xbf16> -> vector<256x15xbf16>
    %c0_8 = arith.constant 0 : index
    %c0_9 = arith.constant 0 : index
    %c0_10 = arith.constant 0 : index
    %37 = vector.load %arg4[%c0_8, %c0_9, %c0_10] : memref<3x15x8xbf16, #tpu.memory_space<vmem>>, vector<1x15x8xbf16>
    %38 = vector.shape_cast %37 : vector<1x15x8xbf16> to vector<15x8xbf16>
    %cst_11 = arith.constant dense<0.000000e+00> : vector<256x8xf32>
    %39 = tpu.matmul %36, %38, %cst_11 {dimension_numbers = #tpu.dot_dimension_numbers<[1], [0], [0], [1], [0, 0, 1, 1], [], []>} : vector<256x15xbf16>, vector<15x8xbf16>, vector<256x8xf32> -> vector<256x8xf32>
    %40 = arith.addf %32, %39 : vector<256x8xf32>
    %41 = vector.extract_strided_slice %26 {offsets = [16, 0], sizes = [256, 5], strides = [1, 1]} : vector<290x5xbf16> to vector<256x5xbf16>
    %42 = vector.extract_strided_slice %1 {offsets = [17, 0], sizes = [256, 5], strides = [1, 1]} : vector<290x5xbf16> to vector<256x5xbf16>
    %43 = vector.extract_strided_slice %31 {offsets = [18, 0], sizes = [256, 5], strides = [1, 1]} : vector<290x5xbf16> to vector<256x5xbf16>
    %44 = tpu.concatenate %41, %42, %43 in 1 : vector<256x5xbf16>, vector<256x5xbf16>, vector<256x5xbf16> -> vector<256x15xbf16>
    %c1 = arith.constant 1 : index
    %c0_12 = arith.constant 0 : index
    %c0_13 = arith.constant 0 : index
    %45 = vector.load %arg4[%c1, %c0_12, %c0_13] : memref<3x15x8xbf16, #tpu.memory_space<vmem>>, vector<1x15x8xbf16>
    %46 = vector.shape_cast %45 : vector<1x15x8xbf16> to vector<15x8xbf16>
    %cst_14 = arith.constant dense<0.000000e+00> : vector<256x8xf32>
    %47 = tpu.matmul %44, %46, %cst_14 {dimension_numbers = #tpu.dot_dimension_numbers<[1], [0], [0], [1], [0, 0, 1, 1], [], []>} : vector<256x15xbf16>, vector<15x8xbf16>, vector<256x8xf32> -> vector<256x8xf32>
    %48 = arith.addf %40, %47 : vector<256x8xf32>
    %49 = vector.extract_strided_slice %26 {offsets = [32, 0], sizes = [256, 5], strides = [1, 1]} : vector<290x5xbf16> to vector<256x5xbf16>
    %50 = vector.extract_strided_slice %1 {offsets = [33, 0], sizes = [256, 5], strides = [1, 1]} : vector<290x5xbf16> to vector<256x5xbf16>
    %51 = vector.extract_strided_slice %31 {offsets = [34, 0], sizes = [256, 5], strides = [1, 1]} : vector<290x5xbf16> to vector<256x5xbf16>
    %52 = tpu.concatenate %49, %50, %51 in 1 : vector<256x5xbf16>, vector<256x5xbf16>, vector<256x5xbf16> -> vector<256x15xbf16>
    %c2 = arith.constant 2 : index
    %c0_15 = arith.constant 0 : index
    %c0_16 = arith.constant 0 : index
    %53 = vector.load %arg4[%c2, %c0_15, %c0_16] : memref<3x15x8xbf16, #tpu.memory_space<vmem>>, vector<1x15x8xbf16>
    %54 = vector.shape_cast %53 : vector<1x15x8xbf16> to vector<15x8xbf16>
    %cst_17 = arith.constant dense<0.000000e+00> : vector<256x8xf32>
    %55 = tpu.matmul %52, %54, %cst_17 {dimension_numbers = #tpu.dot_dimension_numbers<[1], [0], [0], [1], [0, 0, 1, 1], [], []>} : vector<256x15xbf16>, vector<15x8xbf16>, vector<256x8xf32> -> vector<256x8xf32>
    %56 = arith.addf %48, %55 : vector<256x8xf32>
    %c0_18 = arith.constant 0 : index
    %c0_19 = arith.constant 0 : index
    %c0_20 = arith.constant 0 : index
    %57 = vector.load %arg3[%c0_18, %c0_19, %c0_20] : memref<1x3x8xf32, #tpu.memory_space<vmem>>, vector<1x3x8xf32>
    %58 = vector.shape_cast %57 : vector<1x3x8xf32> to vector<3x8xf32>
    %59 = vector.extract_strided_slice %58 {offsets = [0, 0], sizes = [1, 8], strides = [1, 1]} : vector<3x8xf32> to vector<1x8xf32>
    %60 = vector.broadcast %59 : vector<1x8xf32> to vector<256x8xf32>
    %61 = arith.addf %56, %60 : vector<256x8xf32>
    %cst_21 = arith.constant 2.000000e-01 : f32
    %62 = vector.broadcast %cst_21 : f32 to vector<256x8xf32>
    %63 = arith.mulf %62, %61 : vector<256x8xf32>
    %64 = arith.maximumf %61, %63 : vector<256x8xf32>
    %cst_22 = arith.constant dense<0.000000e+00> : vector<8xf32>
    %65 = vector.multi_reduction <add>, %64, %cst_22 [0] : vector<256x8xf32> to vector<8xf32>
    %66 = vector.shape_cast %65 : vector<8xf32> to vector<1x8xf32>
    %cst_23 = arith.constant 3.906250e-03 : f32
    %67 = vector.broadcast %cst_23 : f32 to vector<1x8xf32>
    %68 = arith.mulf %66, %67 : vector<1x8xf32>
    %69 = vector.broadcast %68 : vector<1x8xf32> to vector<256x8xf32>
    %70 = arith.subf %64, %69 : vector<256x8xf32>
    %71 = arith.mulf %70, %70 : vector<256x8xf32>
    %cst_24 = arith.constant dense<0.000000e+00> : vector<8xf32>
    %72 = vector.multi_reduction <add>, %71, %cst_24 [0] : vector<256x8xf32> to vector<8xf32>
    %73 = vector.shape_cast %72 : vector<8xf32> to vector<1x8xf32>
    %cst_25 = arith.constant 3.906250e-03 : f32
    %74 = vector.broadcast %cst_25 : f32 to vector<1x8xf32>
    %75 = arith.mulf %73, %74 : vector<1x8xf32>
    %76 = vector.extract_strided_slice %58 {offsets = [1, 0], sizes = [1, 8], strides = [1, 1]} : vector<3x8xf32> to vector<1x8xf32>
    %cst_26 = arith.constant 9.99999974E-6 : f32
    %77 = vector.broadcast %cst_26 : f32 to vector<1x8xf32>
    %78 = arith.addf %75, %77 : vector<1x8xf32>
    %79 = math.rsqrt %78 : vector<1x8xf32>
    %80 = arith.mulf %76, %79 : vector<1x8xf32>
    %81 = vector.broadcast %80 : vector<1x8xf32> to vector<256x8xf32>
    %82 = arith.mulf %70, %81 : vector<256x8xf32>
    %83 = vector.extract_strided_slice %58 {offsets = [2, 0], sizes = [1, 8], strides = [1, 1]} : vector<3x8xf32> to vector<1x8xf32>
    %84 = vector.broadcast %83 : vector<1x8xf32> to vector<256x8xf32>
    %85 = arith.addf %82, %84 : vector<256x8xf32>
    %86 = arith.truncf %85 : vector<256x8xf32> to vector<256x8xbf16>
    %c0_27 = arith.constant 0 : index
    %c0_28 = arith.constant 0 : index
    %c0_29 = arith.constant 0 : index
    %87 = vector.load %arg5[%c0_27, %c0_28, %c0_29] : memref<1x256x8xbf16, #tpu.memory_space<vmem>>, vector<1x256x8xbf16>
    %88 = vector.shape_cast %87 : vector<1x256x8xbf16> to vector<256x8xbf16>
    %89 = vector.shape_cast %86 : vector<256x8xbf16> to vector<1x256x8xbf16>
    tpu.vector_store %arg5[%c0_27, %c0_28, %c0_29], %89 {strides = array<i32>} : memref<1x256x8xbf16, #tpu.memory_space<vmem>>, vector<1x256x8xbf16>,
    return
  }
  func.func @transform_0(%arg0: i32, %arg1: i32) -> (i32, i32, i32) {
    %c0_i32 = arith.constant 0 : i32
    %c0_i32_0 = arith.constant 0 : i32
    %c0_i32_1 = arith.constant 0 : i32
    return %arg1, %c0_i32, %c0_i32_0 : i32, i32, i32
  }
  func.func @transform_1(%arg0: i32, %arg1: i32) -> (i32, i32, i32) {
    %c0_i32 = arith.constant 0 : i32
    %c0_i32_0 = arith.constant 0 : i32
    return %arg1, %c0_i32, %arg0 : i32, i32, i32
  }
  func.func @transform_2(%arg0: i32, %arg1: i32) -> (i32, i32, i32) {
    %c0_i32 = arith.constant 0 : i32
    %c0_i32_0 = arith.constant 0 : i32
    %c0_i32_1 = arith.constant 0 : i32
    return %c0_i32, %c0_i32_0, %arg0 : i32, i32, i32
  }
  func.func @transform_3(%arg0: i32, %arg1: i32) -> (i32, i32, i32) {
    %c0_i32 = arith.constant 0 : i32
    %c0_i32_0 = arith.constant 0 : i32
    return %arg1, %c0_i32, %arg0 : i32, i32, i32
  }
}

</mosaic_0001>

<bundles_post_ra>
// kernel: tpu_custom_call.1
= control target key start
LH: loop header
LB: loop body
LE: loop exit
PB: predicated region body
PF: predicated region fallthrough
CT: control target
= control target key end

     0   :  { %s3613_s12 = smov 0   ;;  %s3615_s13 = smov 0   ;;  %s5017_s0 = inlined_call_operand.vmem [shape: bf16[2,290,5], index: 0, kind: input, shape index: {}]   ;;  %s5018_s1 = inlined_call_operand.vmem [shape: f32[2,3,8], index: 1, kind: input, shape index: {}]   ;;  %s5019_s2 = inlined_call_operand.vmem [shape: bf16[3,15,8], index: 2, kind: input, shape index: {}]   ;;  %s5020_s3 = inlined_call_operand.vmem [shape: bf16[2,256,8], index: 3, kind: output, shape index: {}]  }
   0x1   :  { %s3617_s14 = smov 0  }
   0x2 LB: > { %s22_s15 = sadd.s32 1, %s3583_s13  ;;  %p3066_p0 = scmp.ge.s32.totalorder %s3587_s14, 1  ;;  %s3587_s14 = sphi %s3617_s14, %s13_s14   ;;  %s3583_s13 = sphi %s3615_s13, %s5135_s13   ;;  %s3579_s12 = sphi %s3613_s12, %s5134_s12  }
   0x3   : > { %p23_p1 = scmp.ge.s32.totalorder %s22_s15, 2  ;;  %p174_p2 = scmp.lt.s32.totalorder %s3587_s14, 3 }
   0x5   : > { %s5137_s15 = smov (%p23_p1, %s22_s15), 0  ;;  %p175_p3 = pnand %p3066_p0, %p174_p2 }
   0x7   : > { %178 = sbr.rel (%p175_p3) target bundleno = 638 (0x27e), region = 32 }
   0xe   : > { %p212_p4 = scmp.lt.s32.totalorder %s3579_s12, 1  ;;  %v274_v0 = vlaneseq  ;;  %vm1321_vm0 = vsmask.f32 7424  ;;  %vm3589_vm1 = vmmov 0   ;;  %vm1569_vm3 = vcmask 1046528   ;;  %s3590_s20 = smov 5  }
   0xf   : > { %vm3675_vm2 = vmpackc.low %vm3589_vm1, %vm3589_vm1  ;;  %s3591_s21 = smov 10  }
  0x10   : > { %s5139_s12 = smov (!%p212_p4, %s3579_s12), 1  ;;  %v3633_v1 = vshrl.u32 %v274_v0, 7 }
  0x11   : > { %s3510_s16 = smul.u32 148, %s5139_s12  ;;  %s3068_s28 = sshll.u32 %s5139_s12, 2 }
  0x12   : > { %v277_v2 = vadd.s32 16, %v3633_v1  ;;  %v279_v3 = vadd.s32 32, %v3633_v1  ;;  %v3639_v4 = vadd.s32 4294967295, %v3633_v1  ;;  %v281_v7 = vadd.s32 48, %v3633_v1  ;;  %s223_s4 = scalar_lea.vmem %s5018_s1, %s3068_s28  ;;  %s3258_s5 = sshll.u32 %s5139_s12, 7 }
  0x13   : > { %s3644_s19 = scalar_lea.vmem %s5017_s0, %s3510_s16  ;;  %v3652_v8 = vadd.s32 64, %v3633_v1  ;;  %v285_v26 = vadd.s32 80, %v3633_v1  ;;  %v3705_v50 = vadd.s32 96, %v3633_v1  ;;  %s4906_s8 = scalar_lea.vmem %s5020_s3, %s3258_s5 }
  0x14   : > { %v3646_v5 = vadd.s32 4294967295, %v277_v2  ;;  %v3648_v6 = vadd.s32 4294967295, %v279_v3  ;;  %v3655_v9 = vld [vmem:[%s3644_s19] sm:$0xf]  ;;  %v238_v10 = vld [vmem:[%s3644_s19 + $0x4] sm:$0xf] }
  0x15   : > { %v3659_v11 = vld [vmem:[%s3644_s19 + $0x8] sm:$0xf]  ;;  %v240_v12 = vld [vmem:[%s3644_s19 + $0xc] sm:$0xf]  ;;  %v3125_v13 = vcombine.low %v3655_v9, %v238_v10  ;;  %v3664_v14 = vld [vmem:[%s3644_s19 + $0x10] sm:$0xf] }
  0x16   : > { %5058 = vst [vmem:[#allocation2_spill] sm:$0xff] %v3646_v5  ;;  %5059 = vst [vmem:[#allocation3_spill] sm:$0xff] %v3648_v6  ;;  %v242_v15 = vld [vmem:[%s3644_s19 + $0x14] sm:$0xf]  ;;  %v3126_v16 = vcombine.low %v3659_v11, %v240_v12  ;;  %v3669_v17 = vld [vmem:[%s3644_s19 + $0x18] sm:$0xf] }
  0x17   : > { %5060 = vst [vmem:[#allocation4_spill] sm:$0xff] %v3659_v11  ;;  %5061 = vst [vmem:[#allocation5_spill] sm:$0xff] %v3664_v14  ;;  %v244_v18 = vld [vmem:[%s3644_s19 + $0x1c] sm:$0xf]  ;;  %v3127_v19 = vcombine.low %v3664_v14, %v242_v15  ;;  %v5022_v20 = vand.u32 15, %v3646_v5  ;;  %v5021_v21 = vand.u32 15, %v3648_v6 }
  0x18   : > { %v1323_v23 = vshrl.u32 %v3125_v13, 16  ;;  %v1325_v24 = vshll.u32 %v3125_v13, 16  ;;  %v3128_v25 = vcombine.low %v3669_v17, %v244_v18  ;;  %v1330_v27 = vshll.u32 %v3126_v16, 16  ;;  %v3694_v37 = vld [vmem:[%s3644_s19 + $0x20] sm:$0xf] }
  0x19   : > { %v1338_v28 = vshll.u32 %v3127_v19, 16  ;;  %v1342_v29 = vshrl.u32 %v3127_v19, 16  ;;  %v1334_v30 = vshrl.u32 %v3126_v16, 16  ;;  %v3683_v33 = vsel %vm3675_vm2, 0, %v240_v12  ;;  %v246_v42 = vld [vmem:[%s3644_s19 + $0x24] sm:$0xf] }
  0x1a   : > { %v1327_v31 = vrot.slane %v1325_v24, 1  ;;  %v1346_v32 = vshll.u32 %v3128_v25, 16  ;;  %5064 = vst [vmem:[#allocation6_spill] sm:$0xff] %v3683_v33  ;;  %vm975_vm4 = vcmp.eq.s32.totalorder %v5022_v20, 0  ;;  %v1332_v34 = vrot.slane %v1330_v27, 1 }
  0x1b   : > { %v1340_v35 = vrot.slane %v1338_v28, 1  ;;  %v3689_v36 = vsel %vm3675_vm2, 0, %v242_v15  ;;  %vm977_vm5 = vcmp.eq.s32.totalorder %v5021_v21, 0  ;;  %vm1086_vm6 = vmpackc.low %vm975_vm4, %vm975_vm4  ;;  %v350_v41 = vsub.s32 0, %v3639_v4  ;;  %v3714_v55 = vld [vmem:[%s3644_s19 + $0x28] sm:$0xf] }
  0x1c   : > { %5065 = vst [vmem:[#allocation7_spill] sm:$0xff] %v3689_v36  ;;  %v1328_v38 = vor.u32 %v1327_v31, %v1323_v23  ;;  %v1348_v39 = vrot.slane %v1346_v32, 1  ;;  %vm1088_vm7 = vmpackc.low %vm977_vm5, %vm977_vm5  ;;  %v1123_v40 = vsel %vm1086_vm6, 0, %v3659_v11  ;;  %v1336_v44 = vor.u32 %v1334_v30, %v1332_v34  ;;  %v248_v56 = vld [vmem:[%s3644_s19 + $0x2c] sm:$0xf] }
  0x1d   : > { %v1344_v43 = vor.u32 %v1342_v29, %v1340_v35  ;;  %v1125_v45 = vsel %vm1088_vm7, 0, %v3664_v14  ;;  %v3143_v46 = vcombine.low %v1123_v40, %v3683_v33  ;;  %v3108_v49 = vmin.u32 %v3639_v4, %v350_v41  ;;  %v3723_v61 = vld [vmem:[%s3644_s19 + $0x30] sm:$0xf]  ;;  %v250_v2 = vld [vmem:[%s3644_s19 + $0x34] sm:$0xf] }
  0x1e   : > { %v1333_v47 = vsel %vm1321_vm0, %v1328_v38, %v1332_v34  ;;  %v3144_v48 = vcombine.low %v1125_v45, %v3689_v36  ;;  %v1341_v52 = vsel %vm1321_vm0, %v1336_v44, %v1340_v35  ;;  %v3129_v54 = vcombine.low %v3694_v37, %v246_v42  ;;  %v3770_v40 = vld [vmem:[%s3644_s19 + $0x38] sm:$0xf]  ;;  %v252_v41 = vld [vmem:[%s3644_s19 + $0x3c] sm:$0xf] }
  0x1f   : > { %1454 = vrot.lane.b32.xlu0 %v1333_v47, %s3590_s20  ;;  %v1349_v51 = vsel %vm1321_vm0, %v1344_v43, %v1348_v39  ;;  %v3710_v53 = vrot.slane %v3143_v46, 1  ;;  %v353_v58 = vand.u32 15, %v3108_v49  ;;  %v1350_v59 = vshrl.u32 %v3128_v25, 16  ;;  %v3782_v46 = vld [vmem:[%s3644_s19 + $0x40] sm:$0xf] }
  0x20   : > { %1458 = vrot.lane.b32.xlu1 %v1349_v51, %s3590_s20  ;;  %v3718_v57 = vrot.slane %v3144_v48, 1  ;;  %v3720_v60 = vadd.s32 4294967295, %v281_v7  ;;  %vm349_vm8 = vcmp.lt.s32.totalorder %v3639_v4, 0  ;;  %v3728_v62 = vsel %vm3675_vm2, 0, %v238_v10 }
  0x21   : > { %v1354_v63 = vshll.u32 %v3129_v54, 16  ;;  %v3731_v0 = vadd.s32 4294967295, %v3652_v8  ;;  %v354_v12 = vsub.s32 0, %v353_v58  ;;  %v3740_v13 = vsel %vm3675_vm2, 0, %v244_v18 }
  0x22   : > { %v1574_v3 = vsel %vm1569_vm3, %v3710_v53, %v3718_v57  ;;  %v5030_v7 = vand.u32 15, %v3720_v60  ;;  %v1352_v4 = vor.u32 %v1350_v59, %v1348_v39  ;;  %v3130_v8 = vcombine.low %v3714_v55, %v248_v56 }
  0x23   : > { %1456 = vrot.lane.b32.xlu0 %v1341_v52, %s3590_s20  ;;  %v1356_v10 = vrot.slane %v1354_v63, 1  ;;  %v5029_v15 = vand.u32 15, %v3731_v0  ;;  %v355_v16 = vsel %vm349_vm8, %v354_v12, %v353_v58  ;;  %v3748_v19 = vcombine.low %v3723_v61, %v250_v2  ;;  %v254_v52 = vld [vmem:[%s3644_s19 + $0x44] sm:$0xf] }
  0x24   : > { %vm979_vm9 = vcmp.eq.s32.totalorder %v5030_v7, 0  ;;  %v3750_v23 = vadd.s32 4294967295, %v285_v26  ;;  %vm608_vm10 = vcmp.ne.s32.totalorder %v355_v16, 0  ;;  %vm645_vm11 = vcmp.lt.s32.totalorder %v355_v16, 0  ;;  %v266_v7 = vld [vmem:[%s3644_s19 + $0x74] sm:$0xf] }
  0x25   : > { %v719_v18 = vadd.s32 16, %v355_v16  ;;  %vm1090_vm12 = vmpackc.low %vm979_vm9, %vm979_vm9  ;;  %v1358_v24 = vshrl.u32 %v3129_v54, 16  ;;  %v3755_v27 = vsel %vm3675_vm2, 0, %v246_v42  ;;  %vm981_vm14 = vcmp.eq.s32.totalorder %v5029_v15, 0 }
  0x26   : > { %vm682_vm13 = vmand %vm645_vm11, %vm608_vm10  ;;  %v1127_v25 = vsel %vm1090_vm12, 0, %v3669_v17  ;;  %v1362_v28 = vshll.u32 %v3130_v8, 16  ;;  %v1357_v29 = vsel %vm1321_vm0, %v1352_v4, %v1356_v10  ;;  %v1366_v31 = vshrl.u32 %v3130_v8, 16 }
  0x27   : > { %1605 = vrot.lane.b32.xlu0 %v1574_v3, %s3591_s21  ;;  %v3760_v26 = vsel %vm682_vm13, %v719_v18, %v355_v16  ;;  %v3145_v30 = vcombine.low %v1127_v25, %v3740_v13  ;;  %vm1092_vm15 = vmpackc.low %vm981_vm14, %vm981_vm14  ;;  %v1370_v34 = vshll.u32 %v3748_v19, 16  ;;  %v5027_v35 = vand.u32 15, %v3750_v23 }
  0x28   : > { %vm973_vm1 = vcmp.eq.s32.totalorder %v3760_v26, 0  ;;  %v1129_v32 = vsel %vm1092_vm15, 0, %v3694_v37  ;;  %v1360_v39 = vor.u32 %v1358_v24, %v1356_v10  ;;  %v289_v42 = vadd.s32 112, %v3633_v1 }
  0x29   : > { %vm1084_vm4 = vmpackc.low %vm973_vm1, %vm973_vm1  ;;  %v3146_v38 = vcombine.low %v1129_v32, %v3755_v27  ;;  %v1364_v44 = vrot.slane %v1362_v28, 1  ;;  %v3777_v45 = vsel %vm3675_vm2, 0, %v248_v56  ;;  %vm983_vm5 = vcmp.eq.s32.totalorder %v5027_v35, 0 }
  0x2a   : > { %v1121_v43 = vsel %vm1084_vm4, 0, %v3655_v9  ;;  %v1575_v48 = vrot.slane %v3145_v30, 1  ;;  %vm1094_vm6 = vmpackc.low %vm983_vm5, %vm983_vm5  ;;  %v3787_v51 = vadd.s32 4294967295, %v3705_v50  ;;  %v1372_v58 = vrot.slane %v1370_v34, 1  ;;  %v256_v30 = vld [vmem:[%s3644_s19 + $0x4c] sm:$0xf] }
  0x2b   : > { %v3142_v47 = vcombine.low %v1121_v43, %v3728_v62  ;;  %1460 = vrot.lane.b32.xlu0 %v1357_v29, %s3590_s20  ;;  %v1577_v49 = vrot.slane %v3146_v38, 1  ;;  %v1368_v54 = vor.u32 %v1366_v31, %v1364_v44  ;;  %v1131_v56 = vsel %vm1094_vm6, 0, %v3714_v55  ;;  %v3817_v31 = vld [vmem:[%s3644_s19 + $0x50] sm:$0xf]  ;;  %v258_v43 = vld [vmem:[%s3644_s19 + $0x54] sm:$0xf] }
  0x2c   : > { %v3132_v59 = vcombine.low %v3770_v40, %v252_v41  ;;  %v3147_v12 = vcombine.low %v1131_v56, %v3777_v45  ;;  %v5026_v4 = vand.u32 15, %v3787_v51  ;;  %v3797_v10 = vsel %vm3675_vm2, 0, %v250_v2  ;;  %v3809_v2 = vld [vmem:[%s3644_s19 + $0x48] sm:$0xf] }
  0x2d   : > { %v1570_v63 = vrot.slane %v3142_v47, 1  ;;  %v1578_v3 = vsel %vm1569_vm3, %v1575_v48, %v1577_v49  ;;  %v1374_v50 = vshrl.u32 %v3748_v19, 16  ;;  %v3133_v16 = vcombine.low %v3782_v46, %v254_v52 }
  0x2e   : > { %v1378_v8 = vshll.u32 %v3132_v59, 16  ;;  %vm985_vm7 = vcmp.eq.s32.totalorder %v5026_v4, 0  ;;  %v1382_v24 = vshrl.u32 %v3132_v59, 16  ;;  %v3806_v25 = vadd.s32 4294967295, %v289_v42 }
  0x2f   : > { %v1572_v18 = vsel %vm1569_vm3, %v1570_v63, %v3710_v53  ;;  %1609 = vrot.lane.b32.xlu0 %v1578_v3, %s3591_s21  ;;  %v1576_v19 = vsel %vm1569_vm3, %v3718_v57, %v1575_v48  ;;  %v1373_v28 = vsel %vm1321_vm0, %v1368_v54, %v1372_v58  ;;  %v1579_v29 = vrot.slane %v3147_v12, 1  ;;  %vm1096_vm8 = vmpackc.low %vm985_vm7, %vm985_vm7 }
  0x30   : > { %1603 = vrot.lane.b32.xlu1 %v1572_v18, %s3591_s21  ;;  %v1386_v53 = vshll.u32 %v3133_v16, 16  ;;  %v1133_v32 = vsel %vm1096_vm8, 0, %v3723_v61  ;;  %v1380_v34 = vrot.slane %v1378_v8, 1  ;;  %v5024_v38 = vand.u32 15, %v3806_v25 }
  0x31   : > { %v291_v42 = vadd.s32 128, %v3633_v1  ;;  %v1365_v47 = vsel %vm1321_vm0, %v1360_v39, %v1364_v44  ;;  %v3148_v57 = vcombine.low %v1133_v32, %v3797_v10  ;;  %v1376_v48 = vor.u32 %v1374_v50, %v1372_v58  ;;  %v260_v32 = vld [vmem:[%s3644_s19 + $0x5c] sm:$0xf] }
  0x32   : > { %v3827_v54 = vsel %vm3675_vm2, 0, %v252_v41  ;;  %v1384_v56 = vor.u32 %v1382_v24, %v1380_v34  ;;  %vm987_vm9 = vcmp.eq.s32.totalorder %v5024_v38, 0  ;;  %v3134_v63 = vcombine.low %v3809_v2, %v256_v30 }
  0x33   : > { %1464 = vrot.lane.b32.xlu0 %v1373_v28, %s3590_s20  ;;  %v3832_v59 = vadd.s32 4294967295, %v291_v42  ;;  %v1581_v39 = vrot.slane %v3148_v57, 1  ;;  %v1388_v44 = vrot.slane %v1386_v53, 1  ;;  %vm1098_vm10 = vmpackc.low %vm987_vm9, %vm987_vm9  ;;  %v1390_v58 = vshrl.u32 %v3133_v16, 16  ;;  %v3843_v53 = vld [vmem:[%s3644_s19 + $0x58] sm:$0xf] }
  0x34   : > { %1607 = vrot.lane.b32.xlu1 %v1576_v19, %s3591_s21  ;;  %v3135_v41 = vcombine.low %v3817_v31, %v258_v43  ;;  %v1580_v3 = vsel %vm1569_vm3, %v1577_v49, %v1579_v29  ;;  %v1135_v12 = vsel %vm1098_vm10, 0, %v3770_v40  ;;  %v1394_v8 = vshll.u32 %v3134_v63, 16  ;;  %5066 = vst [vmem:[#allocation8_spill] sm:$0xff] %v3843_v53 }
  0x35   : > { %v5023_v50 = vand.u32 15, %v3832_v59  ;;  %v1582_v18 = vsel %vm1569_vm3, %v1579_v29, %v1581_v39  ;;  %v3149_v24 = vcombine.low %v1135_v12, %v3827_v54  ;;  %v1398_v19 = vshrl.u32 %v3134_v63, 16 }
  0x36   : > { %v1402_v28 = vshll.u32 %v3135_v41, 16  ;;  %v1381_v16 = vsel %vm1321_vm0, %v1376_v48, %v1380_v34  ;;  %v3849_v49 = vsel %vm3675_vm2, 0, %v254_v52  ;;  %v293_v29 = vadd.s32 144, %v3633_v1  ;;  %v3859_v34 = vld [vmem:[%s3644_s19 + $0x60] sm:$0xf] }
  0x37   : > { %1613 = vrot.lane.b32.xlu0 %v1582_v18, %s3591_s21  ;;  %vm989_vm11 = vcmp.eq.s32.totalorder %v5023_v50, 0  ;;  %v1389_v42 = vsel %vm1321_vm0, %v1384_v56, %v1388_v44  ;;  %v1392_v57 = vor.u32 %v1390_v58, %v1388_v44  ;;  %v1396_v63 = vrot.slane %v1394_v8, 1  ;;  %5067 = vst [vmem:[#allocation9_spill] sm:$0xff] %v3859_v34  ;;  %v262_v48 = vld [vmem:[%s3644_s19 + $0x64] sm:$0xf] }
  0x38   : > { %1462 = vrot.lane.b32.xlu1 %v1365_v47, %s3590_s20  ;;  %vm1100_vm12 = vmpackc.low %vm989_vm11, %vm989_vm11  ;;  %v295_v12 = vadd.s32 160, %v3633_v1  ;;  %v1583_v52 = vrot.slane %v3149_v24, 1  ;;  %v1404_v21 = vrot.slane %v1402_v28, 1  ;;  %v3863_v20 = vadd.s32 4294967295, %v293_v29 }
  0x39   : > { %v1137_v18 = vsel %vm1100_vm12, 0, %v3782_v46  ;;  %v1400_v38 = vor.u32 %v1398_v19, %v1396_v63  ;;  %v3136_v56 = vcombine.low %v3843_v53, %v260_v32  ;;  %v3873_v58 = vsel %vm3675_vm2, 0, %v256_v30 }
  0x3a   : > { %v3150_v50 = vcombine.low %v1137_v18, %v3849_v49  ;;  %v3866_v47 = vadd.s32 4294967295, %v295_v12  ;;  %v5025_v44 = vand.u32 15, %v3863_v20  ;;  %v1406_v8 = vshrl.u32 %v3135_v41, 16  ;;  %v264_v18 = vld [vmem:[%s3644_s19 + $0x6c] sm:$0xf] }
  0x3b   : > { %1468 = vrot.lane.b32.xlu0 %v1389_v42, %s3590_s20  ;;  %v3876_v24 = vcombine.low %v3859_v34, %v262_v48  ;;  %v3884_v29 = vsel %vm3675_vm2, 0, %v258_v43  ;;  %v1410_v42 = vshll.u32 %v3136_v56, 16  ;;  %v1584_v30 = vsel %vm1569_vm3, %v1581_v39, %v1583_v52  ;;  %v3897_v39 = vld [vmem:[%s3644_s19 + $0x68] sm:$0xf] }
  0x3c   : > { %1611 = vrot.lane.b32.xlu1 %v1580_v3, %s3591_s21  ;;  %v3879_v19 = vrot.slane %v3150_v50, 1  ;;  %v5028_v28 = vand.u32 15, %v3866_v47  ;;  %5068 = vst [vmem:[#allocation10_spill] sm:$0xff] %v3884_v29  ;;  %vm991_vm13 = vcmp.eq.s32.totalorder %v5025_v44, 0  ;;  %v297_v12 = vadd.s32 176, %v3633_v1  ;;  %5069 = vst [vmem:[#allocation11_spill] sm:$0xff] %v3897_v39 }
  0x3d   : > { %v1418_v41 = vshll.u32 %v3876_v24, 16  ;;  %v1405_v50 = vsel %vm1321_vm0, %v1400_v38, %v1404_v21  ;;  %vm1102_vm14 = vmpackc.low %vm991_vm13, %vm991_vm13  ;;  %v1414_v43 = vshrl.u32 %v3136_v56, 16  ;;  %v1408_v4 = vor.u32 %v1406_v8, %v1404_v21  ;;  %v3906_v38 = vld [vmem:[%s3644_s19 + $0x70] sm:$0xf] }
  0x3e   : > { %v1586_v3 = vsel %vm1569_vm3, %v1583_v52, %v3879_v19  ;;  %vm993_vm15 = vcmp.eq.s32.totalorder %v5028_v28, 0  ;;  %v1139_v44 = vsel %vm1102_vm14, 0, %v3809_v2  ;;  %v3902_v35 = vadd.s32 4294967295, %v297_v12  ;;  %5070 = vst [vmem:[#allocation12_spill] sm:$0xff] %v3906_v38 }
  0x3f   : > { %1617 = vrot.lane.b32.xlu0 %v1586_v3, %s3591_s21  ;;  %vm1104_vm1 = vmpackc.low %vm993_vm15, %vm993_vm15  ;;  %v299_v52 = vadd.s32 192, %v3633_v1  ;;  %v3151_v28 = vcombine.low %v1139_v44, %v3873_v58  ;;  %v1412_v15 = vrot.slane %v1410_v42, 1  ;;  %v3913_v3 = vsel %vm3675_vm2, 0, %v260_v32 }
  0x40   : > { %1466 = vrot.lane.b32.xlu1 %v1381_v16, %s3590_s20  ;;  %v1141_v56 = vsel %vm1104_vm1, 0, %v3817_v31  ;;  %5071 = vst [vmem:[#allocation13_spill] sm:$0xff] %v3913_v3  ;;  %v1420_v8 = vrot.slane %v1418_v41, 1  ;;  %v5034_v12 = vand.u32 15, %v3902_v35  ;;  %v3138_v16 = vcombine.low %v3897_v39, %v264_v18 }
  0x41   : > { %v3152_v21 = vcombine.low %v1141_v56, %v3884_v29  ;;  %v3918_v36 = vadd.s32 4294967295, %v299_v52  ;;  %v1587_v14 = vrot.slane %v3151_v28, 1  ;;  %v1416_v6 = vor.u32 %v1414_v43, %v1412_v15 }
  0x42   : > { %v1422_v44 = vshrl.u32 %v3876_v24, 16  ;;  %vm995_vm4 = vcmp.eq.s32.totalorder %v5034_v12, 0  ;;  %v3927_v41 = vcombine.low %v3906_v38, %v266_v7  ;;  %v1397_v28 = vsel %vm1321_vm0, %v1392_v57, %v1396_v63  ;;  %v3942_v57 = vld [vmem:[%s3644_s19 + $0x78] sm:$0xf]  ;;  %v3949_v12 = vld [vmem:[%s3644_s19 + $0x80] sm:$0xf] }
  0x43   : > { %1472 = vrot.lane.b32.xlu0 %v1405_v50, %s3590_s20  ;;  %v1589_v42 = vrot.slane %v3152_v21, 1  ;;  %v5036_v32 = vand.u32 15, %v3918_v36  ;;  %v1413_v24 = vsel %vm1321_vm0, %v1408_v4, %v1412_v15  ;;  %vm1106_vm5 = vmpackc.low %vm995_vm4, %vm995_vm4  ;;  %v3934_v50 = vsel %vm3675_vm2, 0, %v262_v48  ;;  %5073 = vst [vmem:[#allocation15_spill] sm:$0xff] %v3942_v57  ;;  %v268_v21 = vld [vmem:[%s3644_s19 + $0x7c] sm:$0xf] }
  0x44   : > { %1615 = vrot.lane.b32.xlu1 %v1584_v30, %s3591_s21  ;;  %5072 = vst [vmem:[#allocation14_spill] sm:$0xff] %v3934_v50  ;;  %v1426_v43 = vshll.u32 %v3138_v16, 16  ;;  %v1143_v56 = vsel %vm1106_vm5, 0, %v3843_v53  ;;  %v1434_v30 = vshll.u32 %v3927_v41, 16  ;;  %v1421_v15 = vsel %vm1321_vm0, %v1416_v6, %v1420_v8  ;;  %v3955_v53 = vld [vmem:[%s3644_s19 + $0x84] sm:$0xf] }
  0x45   : > { %v1590_v52 = vsel %vm1569_vm3, %v1587_v14, %v1589_v42  ;;  %vm997_vm6 = vcmp.eq.s32.totalorder %v5036_v32, 0  ;;  %v3153_v4 = vcombine.low %v1143_v56, %v3913_v3  ;;  %v1430_v63 = vshrl.u32 %v3138_v16, 16 }
  0x46   : > { %vm1108_vm7 = vmpackc.low %vm997_vm6, %vm997_vm6  ;;  %v301_v48 = vadd.s32 208, %v3633_v1  ;;  %v1424_v32 = vor.u32 %v1422_v44, %v1420_v8  ;;  %v1428_v11 = vrot.slane %v1426_v43, 1  ;;  %v303_v5 = vadd.s32 224, %v3633_v1 }
  0x47   : > { %1621 = vrot.lane.b32.xlu0 %v1590_v52, %s3591_s21  ;;  %v1145_v33 = vsel %vm1108_vm7, 0, %v3859_v34  ;;  %v1588_v6 = vsel %vm1569_vm3, %v3879_v19, %v1587_v14  ;;  %v3961_v56 = vrot.slane %v1434_v30, 1  ;;  %v3965_v52 = vsel %vm3675_vm2, 0, %v264_v18 }
  0x48   : > { %1470 = vrot.lane.b32.xlu1 %v1397_v28, %s3590_s20  ;;  %v3154_v16 = vcombine.low %v1145_v33, %v3934_v50  ;;  %5074 = vst [vmem:[#allocation16_spill] sm:$0xff] %v3965_v52  ;;  %v1591_v34 = vrot.slane %v3153_v4, 1  ;;  %v3967_v8 = vadd.s32 4294967295, %v301_v48  ;;  %v3969_v44 = vadd.s32 4294967295, %v303_v5 }
  0x49   : > { %v3140_v43 = vcombine.low %v3942_v57, %v268_v21  ;;  %v1432_v3 = vor.u32 %v1430_v63, %v1428_v11  ;;  %v3976_v14 = vsel %vm3675_vm2, 0, %v266_v7  ;;  %v3160_v33 = vcombine.low %v3949_v12, %v3955_v53 }
  0x4a   : > { %5075 = vst [vmem:[#allocation17_spill] sm:$0xff] %v3969_v44  ;;  %v3972_v28 = vrot.slane %v3154_v16, 1  ;;  %v3982_v19 = vsel %vm1321_vm0, %v1424_v32, %v1428_v11  ;;  %v5046_v5 = vand.u32 15, %v3967_v8  ;;  %v5045_v18 = vand.u32 15, %v3969_v44  ;;  %v3992_v16 = vld [vmem:[%s3644_s19 + $0x88] sm:$0xf] }
  0x4b   : > { %1476 = vrot.lane.b32.xlu0 %v1421_v15, %s3590_s20  ;;  %v1442_v30 = vshll.u32 %v3140_v43, 16  ;;  %v1438_v7 = vshrl.u32 %v3927_v41, 16  ;;  %v1731_v63 = vshll.u32 %v3160_v33, 16  ;;  %v305_v48 = vadd.s32 240, %v3633_v1  ;;  %v272_v32 = vld [vmem:[%s3644_s19 + $0x8c] sm:$0xf] }
  0x4c   : > { %1619 = vrot.lane.b32.xlu1 %v1588_v6, %s3591_s21  ;;  %v1594_v4 = vsel %vm1569_vm3, %v1591_v34, %v3972_v28  ;;  %v1592_v11 = vsel %vm1569_vm3, %v1589_v42, %v1591_v34  ;;  %vm999_vm8 = vcmp.eq.s32.totalorder %v5046_v5, 0  ;;  %vm3999_vm9 = vcmp.eq.s32.totalorder %v5045_v18, 0 }
  0x4d   : > { %v1446_v15 = vshrl.u32 %v3140_v43, 16  ;;  %v1437_v41 = vsel %vm1321_vm0, %v1432_v3, %v3961_v56  ;;  %vm1110_vm10 = vmpackc.low %vm999_vm8, %vm999_vm8  ;;  %v4005_v6 = vrot.slane %v1442_v30, 1  ;;  %v4007_v50 = vadd.s32 4294967295, %v305_v48 }
  0x4e   : > { %v307_v34 = vadd.s32 256, %v3633_v1  ;;  %v1147_v42 = vsel %vm1110_vm10, 0, %v3897_v39  ;;  %vm1112_vm11 = vmpackc.low %vm3999_vm9, %vm3999_vm9  ;;  %v1733_v43 = vrot.slane %v1731_v63, 1  ;;  %v4017_v3 = vsel %vm3675_vm2, 0, %v268_v21 }
  0x4f   : > { %1625 = vrot.lane.b32.xlu0 %v1594_v4, %s3591_s21  ;;  %5078 = vst [vmem:[#allocation18_spill] sm:$0xff] %v4017_v3  ;;  %v3161_v30 = vcombine.low %v3992_v16, %v3992_v16  ;;  %v3155_v48 = vcombine.low %v1147_v42, %v3965_v52  ;;  %v1149_v4 = vsel %vm1112_vm11, 0, %v3906_v38  ;;  %v5054_v18 = vand.u32 15, %v4007_v50 }
  0x50   : > { %1474 = vrot.lane.b32.xlu1 %v1413_v24, %s3590_s20  ;;  %v4025_v5 = vadd.s32 4294967295, %v307_v34  ;;  %v3156_v63 = vcombine.low %v1149_v4, %v3976_v14  ;;  %v4030_v21 = vor.u32 %v1446_v15, %v4005_v6  ;;  %v1735_v39 = vshrl.u32 %v3160_v33, 16  ;;  %v4039_v15 = vld [vmem:[%s3644_s19 + $0x90] sm:$0x1] }
  0x51   : > { %v1739_v29 = vshll.u32 %v3161_v30, 16  ;;  %v1595_v44 = vrot.slane %v3155_v48, 1  ;;  %vm1003_vm12 = vcmp.eq.s32.totalorder %v5054_v18, 0  ;;  %v309_v42 = vadd.s32 272, %v3633_v1 }
  0x52   : > { %v5056_v24 = vand.u32 15, %v4025_v5  ;;  %v1597_v34 = vrot.slane %v3156_v63, 1  ;;  %vm1114_vm13 = vmpackc.low %vm1003_vm12, %vm1003_vm12  ;;  %v1737_v38 = vor.u32 %v1735_v39, %v1733_v43  ;;  %v3201_v4 = vcombine.low %v3992_v16, %v272_v32 }
  0x53   : > { %1480 = vrot.lane.b32.xlu0 %v1437_v41, %s3590_s20  ;;  %v1741_v52 = vrot.slane %v1739_v29, 1  ;;  %v1151_v33 = vsel %vm1114_vm13, 0, %v3942_v57  ;;  %v4046_v30 = vsel %vm3675_vm2, 0, %v3955_v53  ;;  %v4050_v41 = vadd.s32 4294967295, %v309_v42 }
  0x54   : > { %1623 = vrot.lane.b32.xlu1 %v1592_v11, %s3591_s21  ;;  %vm1005_vm14 = vcmp.eq.s32.totalorder %v5056_v24, 0  ;;  %v1598_v29 = vsel %vm1569_vm3, %v1595_v44, %v1597_v34  ;;  %v3157_v39 = vcombine.low %v1151_v33, %v4017_v3  ;;  %v2164_v11 = vshll.u32 %v3201_v4, 16 }
  0x55   : > { %vm1116_vm15 = vmpackc.low %vm1005_vm14, %vm1005_vm14  ;;  %v4055_v48 = vsel %vm1321_vm0, %v1737_v38, %v1741_v52  ;;  %v3202_v53 = vcombine.low %v4039_v15, %v4039_v15  ;;  %v2168_v57 = vshrl.u32 %v3201_v4, 16  ;;  %v1440_v42 = vor.u32 %v1438_v7, %v3961_v56 }
  0x56   : > { %v1153_v63 = vsel %vm1116_vm15, 0, %v3949_v12  ;;  %v1734_v33 = vsel %vm1321_vm0, %v4030_v21, %v1733_v43  ;;  %v2166_v52 = vrot.slane %v2164_v11, 1  ;;  %v1596_v18 = vsel %vm1569_vm3, %v3972_v28, %v1595_v44 }
  0x57   : > { %1629 = vrot.lane.b32.xlu0 %v1598_v29, %s3591_s21  ;;  %v3162_v24 = vcombine.low %v1153_v63, %v4046_v30  ;;  %v5079_v3 = vand.u32 15, %v4050_v41  ;;  %v2172_v4 = vshll.u32 %v3202_v53, 16  ;;  %v4074_v29 = vsel %vm3675_vm2, 0, %v272_v32 }
  0x58   : > { %1478 = vrot.lane.b32.xlu1 %v3982_v19, %s3590_s20  ;;  %v2167_v7 = vsel %vm1321_vm0, %v1737_v38, %v2166_v52  ;;  %v2170_v43 = vor.u32 %v2168_v57, %v2166_v52  ;;  %v3141_v19 = vcombine.low %v3949_v12, %v3949_v12  ;;  %v4081_v11 = vrot.slane %v3157_v39, 1 }
  0x59   : > { %vm1007_vm1 = vcmp.eq.s32.totalorder %v5079_v3, 0  ;;  %v4076_v56 = vrot.slane %v3162_v24, 1  ;;  %v2174_v28 = vrot.slane %v2172_v4, 1  ;;  %v311_v3 = vadd.s32 288, %v3633_v1 }
  0x5a   : > { %vm1118_vm4 = vmpackc.low %vm1007_vm1, %vm1007_vm1  ;;  %v3158_v32 = vcombine.low %v1153_v63, %v1153_v63  ;;  %vm793_vm2 = vcmp.eq.s32.totalorder %v3760_v26, 15  ;;  %v1445_v24 = vsel %vm1321_vm0, %v1440_v42, %v4005_v6  ;;  %v4095_v53 = vshll.u32 %v3141_v19, 16  ;;  %v3560_v26 = vld [vmem:[%s5019_s2] sm:$0xff]   ;;  %v3561_v6 = vld [vmem:[%s5019_s2 + $0x8] sm:$0xff]  }
  0x5b   : > { %v1155_v44 = vsel %vm1118_vm4, 0, %v3992_v16  ;;  %1743 = vrot.lane.b32.xlu0 %v1734_v33, %s3590_s20  ;;  %v1754_v38 = vsel %vm1569_vm3, %v4081_v11, %v4076_v56  ;;  %v2175_v57 = vsel %vm1321_vm0, %v2170_v43, %v2174_v28  ;;  %v3107_v33 = vadd.s32 4294967295, %v311_v3  ;;  %vm901_vm5 = vmpackc.low %vm793_vm2, %vm793_vm2  ;;  %v3562_v63 = vld [vmem:[%s5019_s2 + $0x10] sm:$0xff]  }
  0x5c   : > { %v3203_v22 = vcombine.low %v1155_v44, %v4074_v29  ;;  %1627 = vrot.lane.b32.xlu1 %v1596_v18, %s3591_s21  ;;  %v3163_v39 = vcombine.low %v1155_v44, %v1155_v44  ;;  %v937_v52 = vsel %vm901_vm5, 0, %v3655_v9  ;;  %vm1812_vm6 = vcmask 1047552  }
  0x5d   : > { %v605_v18 = vand.u32 15, %v3107_v33  ;;  %v4100_v4 = vcombine.low %v937_v52, %v3728_v62  ;;  %v1600_v9 = vsel %vm1569_vm3, %v1597_v34, %v4081_v11  ;;  %v1601_v62 = vrot.slane %v3158_v32, 1 }
  0x5e   : > { %v1755_v42 = vrot.slane %v3163_v39, 1  ;;  %v1452_v43 = vrot.slane %v4095_v53, 1  ;;  %v3592_v19 = vmov 65535   ;;  %v4116_v28 = vrot.slane %v3203_v22, 1  ;;  %v5120_v53 = vld [vmem:[#allocation11_spill] sm:$0xff] }
  0x5f   : > { %1757 = vrot.lane.b32.xlu0 %v1754_v38, %s3591_s21  ;;  %vm1009_vm7 = vcmp.eq.s32.totalorder %v605_v18, 0  ;;  %v1813_v44 = vsel %vm1569_vm3, 4294967295, %v3592_v19  ;;  %v5080_v38 = vand.u32 15, %v3720_v60  ;;  %v1602_v19 = vsel %vm1569_vm3, %v4081_v11, %v1601_v62  ;;  %v5123_v62 = vld [vmem:[#allocation15_spill] sm:$0xff] }
  0x60   : > { %1482 = vrot.lane.b32.xlu1 %v1445_v24, %s3590_s20  ;;  %vm1120_vm8 = vmpackc.low %vm1009_vm7, %vm1009_vm7  ;;  %v1814_v3 = vsel %vm1812_vm6, %v1813_v44, 0  ;;  %v5081_v24 = vand.u32 15, %v3731_v0  ;;  %v5084_v0 = vand.u32 15, %v3750_v23  ;;  %v1453_v23 = vsel %vm1321_vm0, %v4030_v21, %v1452_v43  ;;  %v5121_v21 = vld [vmem:[#allocation16_spill] sm:$0xff] }
  0x61   : > { %vm799_vm9 = vcmp.eq.s32.totalorder %v5080_v38, 15  ;;  %v1157_v34 = vsel %vm1120_vm8, 0, %v4039_v15  ;;  %v4128_v32 = vand.u32 %v3560_v26, %v1814_v3  ;;  %v1816_v39 = vand.u32 %v3561_v6, %v1814_v3 }
  0x62   : > { %vm4122_vm10 = vcmp.eq.s32.totalorder %v5081_v24, 15  ;;  %vm907_vm11 = vmpackc.low %vm799_vm9, %vm799_vm9  ;;  %v4130_v22 = vand.u32 %v3562_v63, %v1814_v3  ;;  %v3204_v60 = vcombine.low %v1157_v34, %v1157_v34  ;;  %vm803_vm13 = vcmp.eq.s32.totalorder %v5084_v0, 15  ;;  %v5113_v0 = vld [vmem:[#allocation10_spill] sm:$0xff]  ;;  %v5122_v3 = vld [vmem:[#allocation12_spill] sm:$0xff] }
  0x63   : > { %2176 = vrot.lane.b32.xlu0 %v2167_v7, %s3590_s20  ;;  %v4134_v52 = vsel %vm907_vm11, 0, %v3669_v17  ;;  %vm909_vm12 = vmpackc.low %vm4122_vm10, %vm4122_vm10  ;;  %v5085_v15 = vand.u32 15, %v3787_v51  ;;  %3376 = vmatprep.subr.bf16.mxu0 %v4128_v32  ;;  %v5088_v26 = vand.u32 15, %v3806_v25  ;;  %v5091_v51 = vand.u32 15, %v3832_v59  ;;  %v5114_v7 = vld [vmem:[#allocation8_spill] sm:$0xff] }
  0x64   : > { %1631 = vrot.lane.b32.xlu1 %v1600_v9, %s3591_s21  ;;  %3342 = vmatprep.subr.bf16.mxu1 %v1816_v39  ;;  %v3112_v17 = vcombine.low %v4134_v52, %v3740_v13  ;;  %v4151_v18 = vsel %vm909_vm12, 0, %v3694_v37  ;;  %vm911_vm15 = vmpackc.low %vm803_vm13, %vm803_vm13  ;;  %v2188_v63 = vrot.slane %v3204_v60, 1  ;;  %v5094_v25 = vand.u32 15, %v3863_v20 }
  0x65   : > { %vm4143_vm14 = vcmp.eq.s32.totalorder %v5085_v15, 15  ;;  %vm4155_vm1 = vcmp.eq.s32.totalorder %v5088_v26, 15  ;;  %vm4161_vm4 = vcmp.eq.s32.totalorder %v5091_v51, 15  ;;  %3377 = vmatpush3.bf16.msra.mxu0 %v4128_v32  ;;  %3343 = vmatpush3.bf16.msra.mxu1 %v1816_v39  ;;  %v3113_v37 = vcombine.low %v4151_v18, %v3755_v27  ;;  %v5116_v51 = vld [vmem:[#allocation13_spill] sm:$0xff] }
  0x66   : > { %v4169_v9 = vsel %vm911_vm15, 0, %v3714_v55  ;;  %vm913_vm2 = vmpackc.low %vm4143_vm14, %vm4143_vm14  ;;  %vm4176_vm5 = vcmp.eq.s32.totalorder %v5094_v25, 15  ;;  %3444 = vmatprep.subr.bf16.mxu1 %v4128_v32  ;;  %v5097_v20 = vand.u32 15, %v3866_v47  ;;  %v2189_v11 = vsel %vm1569_vm3, %v4116_v28, %v2188_v63  ;;  %3410 = vmatprep.subr.bf16.mxu0 %v4130_v22  ;;  %v5117_v63 = vld [vmem:[#allocation9_spill] sm:$0xff] }
  0x67   : > { %2178 = vrot.lane.b32.xlu0 %v2175_v57, %s3590_s20  ;;  %v3114_v55 = vcombine.low %v4169_v9, %v3777_v45  ;;  %v4187_v44 = vsel %vm913_vm2, 0, %v3723_v61  ;;  %vm915_vm6 = vmpackc.low %vm4155_vm1, %vm4155_vm1  ;;  %v5100_v47 = vand.u32 15, %v3902_v35  ;;  %v5118_v59 = vand.u32 15, %v4025_v5  ;;  %v5124_v35 = vld [vmem:[#allocation18_spill] sm:$0xff] }
  0x68   : > { %vm4194_vm7 = vcmp.eq.s32.totalorder %v5097_v20, 15  ;;  %1745 = vrot.lane.b32.xlu1 %v4055_v48, %s3590_s20  ;;  %v3115_v61 = vcombine.low %v4187_v44, %v3797_v10  ;;  %v4206_v57 = vsel %vm915_vm6, 0, %v3770_v40  ;;  %vm917_vm8 = vmpackc.low %vm4161_vm4, %vm4161_vm4  ;;  %v1756_v48 = vsel %vm1569_vm3, %v4076_v56, %v1755_v42 }
  0x69   : > { %vm4213_vm9 = vcmp.eq.s32.totalorder %v5100_v47, 15  ;;  %v3116_v38 = vcombine.low %v4206_v57, %v3827_v54  ;;  %v4222_v24 = vsel %vm917_vm8, 0, %v3782_v46  ;;  %vm919_vm10 = vmpackc.low %vm4176_vm5, %vm4176_vm5  ;;  %v5103_v40 = vand.u32 15, %v3918_v36 }
  0x6a   : > { %v3117_v33 = vcombine.low %v4222_v24, %v3849_v49  ;;  %v4236_v42 = vsel %vm919_vm10, 0, %v3809_v2  ;;  %vm921_vm12 = vmpackc.low %vm4194_vm7, %vm4194_vm7  ;;  %v5106_v46 = vand.u32 15, %v3967_v8  ;;  %v5109_v2 = vld [vmem:[#allocation17_spill] sm:$0xff]  ;;  %vm825_vm5 = vcmp.eq.s32.totalorder %v5118_v59, 15  ;;  %v5130_v59 = vld [vmem:[#allocation3_spill] sm:$0xff] }
  0x6b   : > { %vm4229_vm11 = vcmp.eq.s32.totalorder %v5103_v40, 15  ;;  %1633 = vrot.lane.b32.xlu0 %v1602_v19, %s3591_s21  ;;  %v3118_v36 = vcombine.low %v4236_v42, %v3873_v58  ;;  %v4251_v39 = vsel %vm921_vm12, 0, %v3817_v31  ;;  %vm923_vm14 = vmpackc.low %vm4213_vm9, %vm4213_vm9  ;;  %v5110_v60 = vand.u32 15, %v5109_v2 }
  0x6c   : > { %vm4243_vm13 = vcmp.eq.s32.totalorder %v5106_v46, 15  ;;  %1759 = vrot.lane.b32.xlu1 %v1756_v48, %s3591_s21  ;;  %v3119_v15 = vcombine.low %v4251_v39, %v5113_v0  ;;  %v4266_v26 = vsel %vm923_vm14, 0, %v5114_v7  ;;  %vm925_vm1 = vmpackc.low %vm4229_vm11, %vm4229_vm11  ;;  %v5115_v31 = vand.u32 15, %v4007_v50  ;;  %v5119_v50 = vld [vmem:[#allocation14_spill] sm:$0xff] }
  0x6d   : > { %vm4258_vm15 = vcmp.eq.s32.totalorder %v5110_v60, 15  ;;  %v3120_v6 = vcombine.low %v4266_v26, %v5116_v51  ;;  %v4280_v25 = vsel %vm925_vm1, 0, %v5117_v63  ;;  %vm927_vm2 = vmpackc.low %vm4243_vm13, %vm4243_vm13  ;;  %v2187_v40 = vsel %vm1569_vm3, %v4076_v56, %v4116_v28  ;;  %v5126_v28 = vld [vmem:[#allocation2_spill] sm:$0xff] }
  0x6e   : > { %vm823_vm4 = vcmp.eq.s32.totalorder %v5115_v31, 15  ;;  %v3121_v19 = vcombine.low %v4280_v25, %v5119_v50  ;;  %v4290_v20 = vsel %vm927_vm2, 0, %v5120_v53  ;;  %vm929_vm0 = vmpackc.low %vm4258_vm15, %vm4258_vm15  ;;  %v5125_v2 = vand.u32 15, %v4050_v41 }
  0x6f   : > { %v3122_v43 = vcombine.low %v4290_v20, %v5121_v21  ;;  %v4298_v47 = vsel %vm929_vm0, 0, %v5122_v3  ;;  %vm931_vm6 = vmpackc.low %vm823_vm4, %vm823_vm4  ;;  %v5127_v7 = vand.u32 15, %v5126_v28  ;;  %vm1635_vm11 = vcmask 39936   ;;  %v5133_v28 = vld [vmem:[#allocation7_spill] sm:$0xff] }
  0x70   : > { %1484 = vrot.lane.b32.xlu1 %v1453_v23, %s3590_s20  ;;  %v3123_v5 = vcombine.low %v4298_v47, %v3976_v14  ;;  %v967_v48 = vsel %vm931_vm6, 0, %v5123_v62  ;;  %vm933_vm7 = vmpackc.low %vm825_vm5, %vm825_vm5  ;;  %vm827_vm8 = vcmp.eq.s32.totalorder %v5125_v2, 15  ;;  %vm1684_vm12 = vcmask 80896  }
  0x71   : > { %v4308_v46 = vcombine.low %v967_v48, %v5124_v35  ;;  %v969_v34 = vsel %vm933_vm7, 0, %v3949_v12  ;;  %vm935_vm9 = vmpackc.low %vm827_vm8, %vm827_vm8  ;;  %vm795_vm3 = vcmp.eq.s32.totalorder %v5127_v7, 15  ;;  %v5128_v12 = vld [vmem:[#allocation4_spill] sm:$0xff]  ;;  %vm1778_vm13 = vcmask 121856  }
  0x72   : > { %v4314_v60 = vcombine.low %v969_v34, %v4046_v30  ;;  %v4317_v8 = vsel %vm935_vm9, 0, %v3992_v16  ;;  %vm903_vm10 = vmpackc.low %vm795_vm3, %vm795_vm3  ;;  %v5129_v30 = vld [vmem:[#allocation6_spill] sm:$0xff]  ;;  %v5131_v53 = vand.u32 15, %v5130_v59  ;;  %vm2512_vm1 = vcmask 64512  }
  0x73   : > { %v3200_v56 = vcombine.low %v4317_v8, %v4074_v29  ;;  %v939_v41 = vsel %vm903_vm10, 0, %v5128_v12  ;;  %vm2920_vm4 = vcmask 60416  }
  0x74   : > { %2190 = vrot.lane.b32.xlu1 %v2187_v40, %s3591_s21  ;;  %v3110_v23 = vcombine.low %v939_v41, %v5129_v30  ;;  %vm797_vm14 = vcmp.eq.s32.totalorder %v5131_v53, 15  ;;  %v5132_v40 = vld [vmem:[#allocation5_spill] sm:$0xff] }
  0x75   : > { %vm905_vm15 = vmpackc.low %vm797_vm14, %vm797_vm14 }
  0x76   : > { %v941_v35 = vsel %vm905_vm15, 0, %v5132_v40 }
  0x77   : > { %v3111_v7 = vcombine.low %v941_v35, %v5133_v28 }
  0x78   : > { %2192 = vrot.lane.b32.xlu1 %v2189_v11, %s3591_s21 }
  0x91   : > { %v1455_v31 = vpop.permute.xlu0 %1454 }
  0x92   : > { %v1459_v62 = vpop.permute.xlu1 %1458  ;;  %v1638_v2 = vsel %vm1635_vm11, %v4100_v4, %v1455_v31 }
  0x95   : > { %v1457_v63 = vpop.permute.xlu0 %1456 }
  0x96   : > { %v1641_v16 = vsel %vm1635_vm11, %v3110_v23, %v1457_v63  ;;  %v1644_v63 = vsel %vm1635_vm11, %v3111_v7, %v1459_v62 }
  0x99   : > { %v1606_v3 = vpop.permute.xlu0 %1605 }
  0x9a   : > { %v1688_v11 = vsel %vm1684_vm12, %v1641_v16, %v1606_v3 }
  0x9b   : > { %3344 = vmatprep.mubr.msk.bf16.mxu1 %vm1778_vm13, %v1688_v11 }
  0x9d   : > { %v1461_v48 = vpop.permute.xlu0 %1460 }
  0x9e   : > { %v1647_v30 = vsel %vm1635_vm11, %v3112_v17, %v1461_v48 }
  0xa1   : > { %v1610_v34 = vpop.permute.xlu0 %1609 }
  0xa2   : > { %v1604_v12 = vpop.permute.xlu1 %1603  ;;  %v1692_v4 = vsel %vm1684_vm12, %v1647_v30, %v1610_v34 }
  0xa3   : > { %v1686_v41 = vsel %vm1684_vm12, %v1638_v2, %v1604_v12 }
  0xa4   : > { %3378 = vmatprep.mubr.msk.bf16.mxu0 %vm1778_vm13, %v1686_v41 }
  0xa5   : > { %3379 = vmatmul.mubr.msk.bf16.vlgmr.msra.gmra.mrb[0].mxu0 %vm1778_vm13, %v1688_v11  ;;  %v1465_v23 = vpop.permute.xlu0 %1464 }
  0xa6   : > { %v1608_v16 = vpop.permute.xlu1 %1607  ;;  %3411 = vmatpush3.bf16.msra.mxu0 %v4130_v22  ;;  %v1653_v17 = vsel %vm1635_vm11, %v3114_v55, %v1465_v23 }
  0xa7   : > { %v1690_v31 = vsel %vm1684_vm12, %v1644_v63, %v1608_v16 }
  0xa8   : > { %3345 = vmatmul.mubr.msk.bf16.vlgmr.msra.gmra.mrb[0].mxu1 %vm1778_vm13, %v1690_v31  ;;  %3382 = vmatprep.mubr.msk.bf16.mxu0 %vm1778_vm13, %v1690_v31 }
  0xa9   : > { %3445 = vmatpush3.bf16.msra.mxu1 %v4128_v32  ;;  %3348 = vmatprep.mubr.msk.bf16.mxu1 %vm1778_vm13, %v1692_v4  ;;  %v1614_v13 = vpop.permute.xlu0 %1613 }
  0xaa   : > { %v1463_v52 = vpop.permute.xlu1 %1462  ;;  %v1696_v32 = vsel %vm1684_vm12, %v1653_v17, %v1614_v13 }
  0xab   : > { %v1650_v59 = vsel %vm1635_vm11, %v3113_v37, %v1463_v52 }
  0xad   : > { %3383 = vmatmul.mubr.msk.bf16.gmra.mrb[4].mxu0 %vm1778_vm13, %v1692_v4  ;;  %v1469_v22 = vpop.permute.xlu0 %1468 }
  0xae   : > { %v1612_v53 = vpop.permute.xlu1 %1611  ;;  %v1659_v27 = vsel %vm1635_vm11, %v3116_v38, %v1469_v22 }
  0xaf   : > { %v1694_v3 = vsel %vm1684_vm12, %v1650_v59, %v1612_v53 }
  0xb0   : > { %3349 = vmatmul.mubr.msk.bf16.gmra.mrb[4].mxu1 %vm1778_vm13, %v1694_v3  ;;  %3386 = vmatprep.mubr.msk.bf16.mxu0 %vm1778_vm13, %v1694_v3 }
  0xb1   : > { %3352 = vmatprep.mubr.msk.bf16.mxu1 %vm1778_vm13, %v1696_v32  ;;  %v1618_v45 = vpop.permute.xlu0 %1617 }
  0xb2   : > { %v1467_v9 = vpop.permute.xlu1 %1466  ;;  %v1700_v11 = vsel %vm1684_vm12, %v1659_v27, %v1618_v45 }
  0xb3   : > { %v1656_v37 = vsel %vm1635_vm11, %v3115_v61, %v1467_v9 }
  0xb5   : > { %3387 = vmatmul.mubr.msk.bf16.gmra.mrb[8].mxu0 %vm1778_vm13, %v1696_v32  ;;  %v1473_v18 = vpop.permute.xlu0 %1472 }
  0xb6   : > { %v1616_v55 = vpop.permute.xlu1 %1615  ;;  %v1665_v10 = vsel %vm1635_vm11, %v3118_v36, %v1473_v18 }
  0xb7   : > { %v1698_v62 = vsel %vm1684_vm12, %v1656_v37, %v1616_v55  ;;  %v2414_v37 = vsub.s32 0, %v3633_v1 }
  0xb8   : > { %3353 = vmatmul.mubr.msk.bf16.gmra.mrb[8].mxu1 %vm1778_vm13, %v1698_v62  ;;  %3390 = vmatprep.mubr.msk.bf16.mxu0 %vm1778_vm13, %v1698_v62 }
  0xb9   : > { %3356 = vmatprep.mubr.msk.bf16.mxu1 %vm1778_vm13, %v1700_v11  ;;  %v1622_v54 = vpop.permute.xlu0 %1621 }
  0xba   : > { %v1471_v57 = vpop.permute.xlu1 %1470  ;;  %v1704_v48 = vsel %vm1684_vm12, %v1665_v10, %v1622_v54 }
  0xbb   : > { %v1662_v61 = vsel %vm1635_vm11, %v3117_v33, %v1471_v57 }
  0xbd   : > { %3391 = vmatmul.mubr.msk.bf16.gmra.mrb[12].mxu0 %vm1778_vm13, %v1700_v11  ;;  %v1477_v44 = vpop.permute.xlu0 %1476 }
  0xbe   : > { %v1620_v38 = vpop.permute.xlu1 %1619  ;;  %3412 = vmatprep.mubr.msk.bf16.mxu0 %vm1778_vm13, %v1690_v31  ;;  %v1671_v49 = vsel %vm1635_vm11, %v3120_v6, %v1477_v44 }
  0xbf   : > { %v1702_v40 = vsel %vm1684_vm12, %v1662_v61, %v1620_v38 }
  0xc0   : > { %3357 = vmatmul.mubr.msk.bf16.gmra.mrb[12].mxu1 %vm1778_vm13, %v1702_v40 }
  0xc1   : > { %3360 = vmatprep.mubr.msk.bf16.mxu1 %vm1778_vm13, %v1704_v48  ;;  %v1626_v58 = vpop.permute.xlu0 %1625 }
  0xc2   : > { %v1475_v42 = vpop.permute.xlu1 %1474  ;;  %v1708_v35 = vsel %vm1684_vm12, %v1671_v49, %v1626_v58 }
  0xc3   : > { %v1668_v33 = vsel %vm1635_vm11, %v3119_v15, %v1475_v42 }
  0xc5   : > { %3413 = vmatmul.mubr.msk.bf16.vlgmr.msra.gmra.mrb[0].mxu0 %vm1778_vm13, %v1692_v4  ;;  %v1481_v24 = vpop.permute.xlu0 %1480 }
  0xc6   : > { %v1624_v36 = vpop.permute.xlu1 %1623  ;;  %3416 = vmatprep.mubr.msk.bf16.mxu0 %vm1778_vm13, %v1694_v3  ;;  %v1677_v39 = vsel %vm1635_vm11, %v3122_v43, %v1481_v24 }
  0xc7   : > { %v1706_v34 = vsel %vm1684_vm12, %v1668_v33, %v1624_v36 }
  0xc8   : > { %3361 = vmatmul.mubr.msk.bf16.gmra.mrb[16].mxu1 %vm1778_vm13, %v1706_v34 }
  0xc9   : > { %3364 = vmatprep.mubr.msk.bf16.mxu1 %vm1778_vm13, %v1708_v35  ;;  %v1630_v26 = vpop.permute.xlu0 %1629 }
  0xca   : > { %v1479_v51 = vpop.permute.xlu1 %1478  ;;  %v1712_v2 = vsel %vm1684_vm12, %v1677_v39, %v1630_v26 }
  0xcb   : > { %v1674_v15 = vsel %vm1635_vm11, %v3121_v19, %v1479_v51 }
  0xcd   : > { %3417 = vmatmul.mubr.msk.bf16.gmra.mrb[4].mxu0 %vm1778_vm13, %v1696_v32  ;;  %v1744_v0 = vpop.permute.xlu0 %1743 }
  0xce   : > { %v1628_v6 = vpop.permute.xlu1 %1627  ;;  %3420 = vmatprep.mubr.msk.bf16.mxu0 %vm1778_vm13, %v1698_v62  ;;  %v1762_v21 = vsel %vm1635_vm11, %v4308_v46, %v1744_v0 }
  0xcf   : > { %v1710_v28 = vsel %vm1684_vm12, %v1674_v15, %v1628_v6 }
  0xd0   : > { %3365 = vmatmul.mubr.msk.bf16.gmra.mrb[20].mxu1 %vm1778_vm13, %v1710_v28 }
  0xd1   : > { %3368 = vmatprep.mubr.msk.bf16.mxu1 %vm1778_vm13, %v1712_v2  ;;  %v1758_v43 = vpop.permute.xlu0 %1757 }
  0xd2   : > { %v1483_v20 = vpop.permute.xlu1 %1482  ;;  %v1767_v19 = vsel %vm1684_vm12, %v1762_v21, %v1758_v43 }
  0xd3   : > { %v1680_v25 = vsel %vm1635_vm11, %v3123_v5, %v1483_v20 }
  0xd5   : > { %3421 = vmatmul.mubr.msk.bf16.gmra.mrb[8].mxu0 %vm1778_vm13, %v1700_v11  ;;  %v2177_v30 = vpop.permute.xlu0 %2176  ;;  %v4478_v11 = vld [vmem:[%s223_s4] sm:$0x7] }
  0xd6   : > { %v1632_v50 = vpop.permute.xlu1 %1631  ;;  %3424 = vmatprep.mubr.msk.bf16.mxu0 %vm1778_vm13, %v1702_v40  ;;  %v2195_v23 = vsel %vm1635_vm11, %v4314_v60, %v2177_v30  ;;  %v4487_v10 = vrot.slane %v4478_v11, %v2414_v37 }
  0xd7   : > { %v1714_v7 = vsel %vm1684_vm12, %v1680_v25, %v1632_v50 }
  0xd8   : > { %3369 = vmatmul.mubr.msk.bf16.gmra.mrb[24].mxu1 %vm1778_vm13, %v1714_v7 }
  0xd9   : > { %3372 = vmatprep.mubr.msk.bf16.mxu1 %vm1778_vm13, %v1767_v19  ;;  %v2179_v4 = vpop.permute.xlu0 %2178 }
  0xda   : > { %v1746_v12 = vpop.permute.xlu1 %1745  ;;  %v2198_v31 = vsel %vm1635_vm11, %v3200_v56, %v2179_v4 }
  0xdb   : > { %v1765_v41 = vsel %vm1635_vm11, %v4314_v60, %v1746_v12 }
  0xdd   : > { %3425 = vmatmul.mubr.msk.bf16.gmra.mrb[12].mxu0 %vm1778_vm13, %v1704_v48  ;;  %v1634_v17 = vpop.permute.xlu0 %1633 }
  0xde   : > { %v1760_v14 = vpop.permute.xlu1 %1759  ;;  %3428 = vmatprep.mubr.msk.bf16.mxu0 %vm1778_vm13, %v1706_v34 }
  0xdf   : > { %v1769_v47 = vsel %vm1684_vm12, %v1765_v41, %v1760_v14 }
  0xe0   : > { %3373 = vmatmul.mubr.msk.bf16.gmra.mrb[28].mxu1 %vm1778_vm13, %v1769_v47 }
  0xe1   : > { %3394 = vmatprep.mubr.msk.bf16.mxu1 %vm1778_vm13, %v1702_v40 }
  0xe2   : > { %v1485_v5 = vpop.permute.xlu1 %1484 }
  0xe3   : > { %v1683_v52 = vsel %vm1635_vm11, %v4308_v46, %v1485_v5 }
  0xe4   : > { %v1716_v22 = vsel %vm1684_vm12, %v1683_v52, %v1634_v17 }
  0xe5   : > { %3429 = vmatmul.mubr.msk.bf16.gmra.mrb[16].mxu0 %vm1778_vm13, %v1708_v35 }
  0xe6   : > { %3432 = vmatprep.mubr.msk.bf16.mxu0 %vm1778_vm13, %v1710_v28  ;;  %v2191_v63 = vpop.permute.xlu1 %2190 }
  0xe7   : > { %v2200_v16 = vsel %vm1684_vm12, %v2195_v23, %v2191_v63 }
  0xe8   : > { %3395 = vmatmul.mubr.msk.bf16.vlgmr.msra.gmra.mrb[16].mxu1 %vm1778_vm13, %v1704_v48 }
  0xe9   : > { %3398 = vmatprep.mubr.msk.bf16.mxu1 %vm1778_vm13, %v1706_v34 }
  0xea   : > { %v2193_v13 = vpop.permute.xlu1 %2192 }
  0xeb   : > { %v2202_v60 = vsel %vm1684_vm12, %v2198_v31, %v2193_v13 }
  0xed   : > { %3433 = vmatmul.mubr.msk.bf16.gmra.mrb[20].mxu0 %vm1778_vm13, %v1712_v2 }
  0xee   : > { %3436 = vmatprep.mubr.msk.bf16.mxu0 %vm1778_vm13, %v1714_v7 }
  0xf0   : > { %3399 = vmatmul.mubr.msk.bf16.gmra.mrb[20].mxu1 %vm1778_vm13, %v1708_v35 }
  0xf1   : > { %3402 = vmatprep.mubr.msk.bf16.mxu1 %vm1778_vm13, %v1710_v28 }
  0xf5   : > { %3437 = vmatmul.mubr.msk.bf16.gmra.mrb[24].mxu0 %vm1778_vm13, %v1767_v19 }
  0xf6   : > { %3440 = vmatprep.mubr.msk.bf16.mxu0 %vm1778_vm13, %v2200_v16 }
  0xf8   : > { %3403 = vmatmul.mubr.msk.bf16.gmra.mrb[24].mxu1 %vm1778_vm13, %v1712_v2 }
  0xf9   : > { %3406 = vmatprep.mubr.msk.bf16.mxu1 %vm1778_vm13, %v1714_v7 }
  0xfd   : > { %3441 = vmatmul.mubr.msk.bf16.gmra.mrb[28].mxu0 %vm1778_vm13, %v2202_v60 }
 0x100   : > { %3407 = vmatmul.mubr.msk.bf16.gmra.mrb[28].mxu1 %vm1778_vm13, %v1716_v22 }
 0x17b   : > { %v3346_v29 = vpop.f32.mrb[0].mxu1 }
 0x17c   : > { %v1852_v8 = vpop.f32.mrb[1].mxu1 }
 0x17d   : > { %v3347_v56 = vpop.f32.mrb[2].mxu1 }
 0x17e   : > { %v1855_v59 = vpop.f32.mrb[3].mxu1 }
 0x183   : > { %v3350_v53 = vpop.f32.mrb[4].mxu1 }
 0x184   : > { %v1868_v32 = vpop.f32.mrb[5].mxu1 }
 0x185   : > { %v3351_v3 = vpop.f32.mrb[6].mxu1 }
 0x186   : > { %v1871_v45 = vpop.f32.mrb[7].mxu1 }
 0x18b   : > { %v3354_v9 = vpop.f32.mrb[8].mxu1 }
 0x18c   : > { %v4465_v27 = vpop.f32.mrb[9].mxu1 }
 0x18d   : > { %v4467_v46 = vpop.f32.mrb[10].mxu1 }
 0x18e   : > { %v4470_v18 = vpop.f32.mrb[11].mxu1 }
 0x193   : > { %v4476_v55 = vpop.f32.mrb[12].mxu1 }
 0x194   : > { %v4480_v62 = vpop.f32.mrb[13].mxu1 }
 0x195   : > { %v4482_v54 = vpop.f32.mrb[14].mxu1 }
 0x196   : > { %v4484_v57 = vpop.f32.mrb[15].mxu1 }
 0x198   : > { %v3414_v44 = vpop.f32.mrb[0].mxu0 }
 0x199   : > { %v3446_v61 = vadd.f32 %v3414_v44, %v3346_v29  ;;  %v2252_v38 = vpop.f32.mrb[1].mxu0 }
 0x19a   : > { %v3447_v48 = vadd.f32 %v2252_v38, %v1852_v8  ;;  %v3415_v40 = vpop.f32.mrb[2].mxu0 }
 0x19b   : > { %v2418_v58 = vadd.f32 %v3446_v61, %v4487_v10  ;;  %v3448_v42 = vadd.f32 %v3415_v40, %v3347_v56  ;;  %v2255_v49 = vpop.f32.mrb[3].mxu0 }
 0x19c   : > { %v2416_v24 = vadd.f32 %v3447_v48, %v4487_v10  ;;  %v3449_v33 = vadd.f32 %v2255_v49, %v1855_v59 }
 0x19d   : > { %v2419_v36 = vadd.f32 %v3448_v42, %v4487_v10  ;;  %v2450_v35 = vmul.f32 0.2, %v2418_v58 }
 0x19e   : > { %v2448_v34 = vmul.f32 0.2, %v2416_v24  ;;  %v2417_v26 = vadd.f32 %v3449_v33, %v4487_v10 }
 0x19f   : > { %v2451_v51 = vmul.f32 0.2, %v2419_v36  ;;  %v4495_v28 = vmax.f32 %v2418_v58, %v2450_v35 }
 0x1a0   : > { %v4493_v39 = vmax.f32 %v2416_v24, %v2448_v34  ;;  %v2449_v0 = vmul.f32 0.2, %v2417_v26  ;;  %v3418_v15 = vpop.f32.mrb[4].mxu0 }
 0x1a1   : > { %v3450_v6 = vadd.f32 %v3418_v15, %v3350_v53  ;;  %v2268_v2 = vpop.f32.mrb[5].mxu0  ;;  %v4499_v25 = vmax.f32 %v2419_v36, %v2451_v51  ;;  %v2516_v23 = vsel %vm2512_vm1, %v4495_v28, 0.0 }
 0x1a2   : > { %v4497_v20 = vmax.f32 %v2417_v26, %v2449_v0  ;;  %v3451_v21 = vadd.f32 %v2268_v2, %v1868_v32  ;;  %v3419_v43 = vpop.f32.mrb[6].mxu0  ;;  %v2513_v12 = vsel %vm2512_vm1, %v4493_v39, 0.0 }
 0x1a3   : > { %v2422_v50 = vadd.f32 %v3450_v6, %v4487_v10  ;;  %v3452_v19 = vadd.f32 %v3419_v43, %v3351_v3  ;;  %v2271_v7 = vpop.f32.mrb[7].mxu0  ;;  %v2518_v13 = vsel %vm2512_vm1, %v4499_v25, 0.0 }
 0x1a4   : > { %v2514_v41 = vsel %vm2512_vm1, %v4497_v20, 0.0  ;;  %v2420_v14 = vadd.f32 %v3451_v21, %v4487_v10  ;;  %v3453_v47 = vadd.f32 %v2271_v7, %v1871_v45 }
 0x1a5   : > { %v2515_v5 = vadd.f32 %v2514_v41, %v2513_v12  ;;  %v2423_v30 = vadd.f32 %v3452_v19, %v4487_v10  ;;  %v2454_v63 = vmul.f32 0.2, %v2422_v50 }
 0x1a6   : > { %v2452_v16 = vmul.f32 0.2, %v2420_v14  ;;  %v2421_v4 = vadd.f32 %v3453_v47, %v4487_v10 }
 0x1a7   : > { %v2517_v31 = vadd.f32 %v2516_v23, %v2515_v5  ;;  %v2455_v52 = vmul.f32 0.2, %v2423_v30  ;;  %v4515_v59 = vmax.f32 %v2422_v50, %v2454_v63 }
 0x1a8   : > { %v4513_v60 = vmax.f32 %v2420_v14, %v2452_v16  ;;  %v2453_v17 = vmul.f32 0.2, %v2421_v4  ;;  %v3422_v22 = vpop.f32.mrb[8].mxu0 }
 0x1a9   : > { %v2519_v29 = vadd.f32 %v2518_v13, %v2517_v31  ;;  %v3454_v8 = vadd.f32 %v3422_v22, %v3354_v9  ;;  %v2284_v56 = vpop.f32.mrb[9].mxu0  ;;  %v4524_v48 = vmax.f32 %v2423_v30, %v2455_v52 }
 0x1aa   : > { %v2520_v53 = vsel %vm2512_vm1, %v4513_v60, 0.0  ;;  %v4519_v32 = vmax.f32 %v2421_v4, %v2453_v17  ;;  %v3455_v3 = vadd.f32 %v2284_v56, %v4465_v27  ;;  %v3423_v45 = vpop.f32.mrb[10].mxu0  ;;  %v2524_v27 = vsel %vm2512_vm1, %v4515_v59, 0.0 }
 0x1ab   : > { %v2521_v37 = vadd.f32 %v2520_v53, %v2519_v29  ;;  %v2426_v44 = vadd.f32 %v3454_v8, %v4487_v10  ;;  %v3456_v61 = vadd.f32 %v3423_v45, %v4467_v46  ;;  %v2287_v38 = vpop.f32.mrb[11].mxu0  ;;  %v2526_v35 = vsel %vm2512_vm1, %v4524_v48, 0.0 }
 0x1ac   : > { %v2522_v9 = vsel %vm2512_vm1, %v4519_v32, 0.0  ;;  %v2424_v40 = vadd.f32 %v3455_v3, %v4487_v10  ;;  %v3457_v58 = vadd.f32 %v2287_v38, %v4470_v18 }
 0x1ad   : > { %v2523_v42 = vadd.f32 %v2522_v9, %v2521_v37  ;;  %v2427_v49 = vadd.f32 %v3456_v61, %v4487_v10  ;;  %v2458_v24 = vmul.f32 0.2, %v2426_v44 }
 0x1ae   : > { %v2456_v33 = vmul.f32 0.2, %v2424_v40  ;;  %v2425_v46 = vadd.f32 %v3457_v58, %v4487_v10 }
 0x1af   : > { %v2525_v36 = vadd.f32 %v2524_v27, %v2523_v42  ;;  %v2459_v26 = vmul.f32 0.2, %v2427_v49  ;;  %v4539_v2 = vmax.f32 %v2426_v44, %v2458_v24 }
 0x1b0   : > { %v4536_v34 = vmax.f32 %v2424_v40, %v2456_v33  ;;  %v2457_v51 = vmul.f32 0.2, %v2425_v46  ;;  %v3426_v0 = vpop.f32.mrb[12].mxu0 }
 0x1b1   : > { %v2527_v18 = vadd.f32 %v2526_v35, %v2525_v36  ;;  %v3458_v15 = vadd.f32 %v3426_v0, %v4476_v55  ;;  %v2300_v6 = vpop.f32.mrb[13].mxu0  ;;  %v4548_v47 = vmax.f32 %v2427_v49, %v2459_v26 }
 0x1b2   : > { %v2528_v21 = vsel %vm2512_vm1, %v4536_v34, 0.0  ;;  %v4543_v43 = vmax.f32 %v2425_v46, %v2457_v51  ;;  %v3459_v50 = vadd.f32 %v2300_v6, %v4480_v62  ;;  %v3427_v19 = vpop.f32.mrb[14].mxu0  ;;  %v2532_v62 = vsel %vm2512_vm1, %v4539_v2, 0.0 }
 0x1b3   : > { %v2529_v7 = vadd.f32 %v2528_v21, %v2527_v18  ;;  %v2430_v12 = vadd.f32 %v3458_v15, %v4487_v10  ;;  %v3460_v41 = vadd.f32 %v3427_v19, %v4482_v54  ;;  %v2303_v14 = vpop.f32.mrb[15].mxu0  ;;  %v2534_v13 = vsel %vm2512_vm1, %v4548_v47, 0.0 }
 0x1b4   : > { %v2530_v55 = vsel %vm2512_vm1, %v4543_v43, 0.0  ;;  %v2428_v5 = vadd.f32 %v3459_v50, %v4487_v10  ;;  %v3461_v30 = vadd.f32 %v2303_v14, %v4484_v57 }
 0x1b5   : > { %v2531_v23 = vadd.f32 %v2530_v55, %v2529_v7  ;;  %v2431_v63 = vadd.f32 %v3460_v41, %v4487_v10  ;;  %v2462_v16 = vmul.f32 0.2, %v2430_v12 }
 0x1b6   : > { %v2460_v4 = vmul.f32 0.2, %v2428_v5  ;;  %v2429_v54 = vadd.f32 %v3461_v30, %v4487_v10 }
 0x1b7   : > { %v2533_v31 = vadd.f32 %v2532_v62, %v2531_v23  ;;  %v2463_v17 = vmul.f32 0.2, %v2431_v63  ;;  %v4562_v56 = vmax.f32 %v2430_v12, %v2462_v16 }
 0x1b8   : > { %v4560_v52 = vmax.f32 %v2428_v5, %v2460_v4  ;;  %v2461_v22 = vmul.f32 0.2, %v2429_v54  ;;  %v3430_v29 = vpop.f32.mrb[16].mxu0 }
 0x1b9   : > { %v2535_v57 = vadd.f32 %v2534_v13, %v2533_v31  ;;  %v2316_v8 = vpop.f32.mrb[17].mxu0  ;;  %v4568_v38 = vmax.f32 %v2431_v63, %v2463_v17  ;;  %v2540_v24 = vsel %vm2512_vm1, %v4562_v56, 0.0 }
 0x1ba   : > { %v2536_v53 = vsel %vm2512_vm1, %v4560_v52, 0.0  ;;  %v4566_v3 = vmax.f32 %v2429_v54, %v2461_v22  ;;  %v3431_v45 = vpop.f32.mrb[18].mxu0 }
 0x1bb   : > { %v2537_v37 = vadd.f32 %v2536_v53, %v2535_v57  ;;  %v3396_v44 = vpop.f32.mrb[16].mxu1  ;;  %v2319_v61 = vpop.f32.mrb[19].mxu0  ;;  %v2542_v0 = vsel %vm2512_vm1, %v4568_v38, 0.0 }
 0x1bc   : > { %v2538_v9 = vsel %vm2512_vm1, %v4566_v3, 0.0  ;;  %v3462_v40 = vadd.f32 %v3430_v29, %v3396_v44  ;;  %v2089_v58 = vpop.f32.mrb[17].mxu1 }
 0x1bd   : > { %v2539_v42 = vadd.f32 %v2538_v9, %v2537_v37  ;;  %v3463_v49 = vadd.f32 %v2316_v8, %v2089_v58  ;;  %v3397_v27 = vpop.f32.mrb[18].mxu1 }
 0x1be   : > { %v2434_v33 = vadd.f32 %v3462_v40, %v4487_v10  ;;  %v3464_v46 = vadd.f32 %v3431_v45, %v3397_v27  ;;  %v2092_v36 = vpop.f32.mrb[19].mxu1 }
 0x1bf   : > { %v2541_v35 = vadd.f32 %v2540_v24, %v2539_v42  ;;  %v2432_v26 = vadd.f32 %v3463_v49, %v4487_v10  ;;  %v3465_v51 = vadd.f32 %v2319_v61, %v2092_v36 }
 0x1c0   : > { %v2435_v18 = vadd.f32 %v3464_v46, %v4487_v10  ;;  %v3434_v15 = vpop.f32.mrb[20].mxu0  ;;  %v2466_v6 = vmul.f32 0.2, %v2434_v33 }
 0x1c1   : > { %v2464_v21 = vmul.f32 0.2, %v2432_v26  ;;  %v2543_v50 = vadd.f32 %v2542_v0, %v2541_v35  ;;  %v2433_v19 = vadd.f32 %v3465_v51, %v4487_v10  ;;  %v2332_v7 = vpop.f32.mrb[21].mxu0 }
 0x1c2   : > { %v3435_v12 = vpop.f32.mrb[22].mxu0  ;;  %v2467_v14 = vmul.f32 0.2, %v2435_v18  ;;  %v4582_v62 = vmax.f32 %v2434_v33, %v2466_v6 }
 0x1c3   : > { %v4580_v41 = vmax.f32 %v2432_v26, %v2464_v21  ;;  %v2465_v55 = vmul.f32 0.2, %v2433_v19  ;;  %v3400_v5 = vpop.f32.mrb[20].mxu1  ;;  %v2335_v30 = vpop.f32.mrb[23].mxu0 }
 0x1c4   : > { %v3466_v23 = vadd.f32 %v3434_v15, %v3400_v5  ;;  %v2105_v63 = vpop.f32.mrb[21].mxu1  ;;  %v4589_v57 = vmax.f32 %v2435_v18, %v2467_v14  ;;  %v2548_v9 = vsel %vm2512_vm1, %v4582_v62, 0.0 }
 0x1c5   : > { %v2544_v16 = vsel %vm2512_vm1, %v4580_v41, 0.0  ;;  %v4586_v4 = vmax.f32 %v2433_v19, %v2465_v55  ;;  %v3467_v54 = vadd.f32 %v2332_v7, %v2105_v63  ;;  %v3401_v31 = vpop.f32.mrb[22].mxu1 }
 0x1c6   : > { %v2545_v13 = vadd.f32 %v2544_v16, %v2543_v50  ;;  %v2438_v17 = vadd.f32 %v3466_v23, %v4487_v10  ;;  %v3468_v22 = vadd.f32 %v3435_v12, %v3401_v31  ;;  %v2108_v29 = vpop.f32.mrb[23].mxu1  ;;  %v2550_v46 = vsel %vm2512_vm1, %v4589_v57, 0.0 }
 0x1c7   : > { %v2546_v8 = vsel %vm2512_vm1, %v4586_v4, 0.0  ;;  %v2436_v53 = vadd.f32 %v3467_v54, %v4487_v10  ;;  %v3469_v45 = vadd.f32 %v2335_v30, %v2108_v29 }
 0x1c8   : > { %v2547_v37 = vadd.f32 %v2546_v8, %v2545_v13  ;;  %v2439_v44 = vadd.f32 %v3468_v22, %v4487_v10  ;;  %v3438_v61 = vpop.f32.mrb[24].mxu0  ;;  %v2470_v40 = vmul.f32 0.2, %v2438_v17 }
 0x1c9   : > { %v2468_v58 = vmul.f32 0.2, %v2436_v53  ;;  %v2437_v42 = vadd.f32 %v3469_v45, %v4487_v10  ;;  %v2348_v49 = vpop.f32.mrb[25].mxu0 }
 0x1ca   : > { %v2549_v27 = vadd.f32 %v2548_v9, %v2547_v37  ;;  %v2471_v24 = vmul.f32 0.2, %v2439_v44  ;;  %v3439_v33 = vpop.f32.mrb[26].mxu0  ;;  %v4602_v6 = vmax.f32 %v2438_v17, %v2470_v40 }
 0x1cb   : > { %v4600_v36 = vmax.f32 %v2436_v53, %v2468_v58  ;;  %v2469_v35 = vmul.f32 0.2, %v2437_v42  ;;  %v3404_v26 = vpop.f32.mrb[24].mxu1  ;;  %v2351_v51 = vpop.f32.mrb[27].mxu0 }
 0x1cc   : > { %v2551_v0 = vadd.f32 %v2550_v46, %v2549_v27  ;;  %v3470_v18 = vadd.f32 %v3438_v61, %v3404_v26  ;;  %v2121_v15 = vpop.f32.mrb[25].mxu1  ;;  %v4608_v14 = vmax.f32 %v2439_v44, %v2471_v24  ;;  %v2556_v17 = vsel %vm2512_vm1, %v4602_v6, 0.0 }
 0x1cd   : > { %v2552_v21 = vsel %vm2512_vm1, %v4600_v36, 0.0  ;;  %v4606_v50 = vmax.f32 %v2437_v42, %v2469_v35  ;;  %v3471_v19 = vadd.f32 %v2348_v49, %v2121_v15  ;;  %v3405_v7 = vpop.f32.mrb[26].mxu1 }
 0x1ce   : > { %v2553_v12 = vadd.f32 %v2552_v21, %v2551_v0  ;;  %v2442_v55 = vadd.f32 %v3470_v18, %v4487_v10  ;;  %v3472_v5 = vadd.f32 %v3439_v33, %v3405_v7  ;;  %v2124_v30 = vpop.f32.mrb[27].mxu1  ;;  %v2558_v45 = vsel %vm2512_vm1, %v4608_v14, 0.0 }
 0x1cf   : > { %v2554_v23 = vsel %vm2512_vm1, %v4606_v50, 0.0  ;;  %v2440_v63 = vadd.f32 %v3471_v19, %v4487_v10  ;;  %v3473_v16 = vadd.f32 %v2351_v51, %v2124_v30 }
 0x1d0   : > { %v2555_v54 = vadd.f32 %v2554_v23, %v2553_v12  ;;  %v2443_v31 = vadd.f32 %v3472_v5, %v4487_v10  ;;  %v3442_v13 = vpop.f32.mrb[28].mxu0  ;;  %v2474_v22 = vmul.f32 0.2, %v2442_v55 }
 0x1d1   : > { %v2472_v29 = vmul.f32 0.2, %v2440_v63  ;;  %v2441_v8 = vadd.f32 %v3473_v16, %v4487_v10  ;;  %v2364_v53 = vpop.f32.mrb[29].mxu0 }
 0x1d2   : > { %v2557_v37 = vadd.f32 %v2556_v17, %v2555_v54  ;;  %v3443_v44 = vpop.f32.mrb[30].mxu0  ;;  %v2475_v9 = vmul.f32 0.2, %v2443_v31  ;;  %v2506_v33 = vmax.f32 %v2442_v55, %v2474_v22 }
 0x1d3   : > { %v4620_v61 = vmax.f32 %v2440_v63, %v2472_v29  ;;  %v2473_v40 = vmul.f32 0.2, %v2441_v8  ;;  %v3408_v58 = vpop.f32.mrb[28].mxu1  ;;  %v2367_v42 = vpop.f32.mrb[31].mxu0 }
 0x1d4   : > { %v2559_v49 = vadd.f32 %v2558_v45, %v2557_v37  ;;  %v3474_v27 = vadd.f32 %v3442_v13, %v3408_v58  ;;  %v2137_v24 = vpop.f32.mrb[29].mxu1  ;;  %v2507_v19 = vmax.f32 %v2443_v31, %v2475_v9  ;;  %v2564_v23 = vsel %vm2512_vm1, %v2506_v33, 0.0 }
 0x1d5   : > { %v2560_v46 = vsel %vm2512_vm1, %v4620_v61, 0.0  ;;  %v2505_v35 = vmax.f32 %v2441_v8, %v2473_v40  ;;  %v3475_v26 = vadd.f32 %v2364_v53, %v2137_v24  ;;  %v3409_v51 = vpop.f32.mrb[30].mxu1 }
 0x1d6   : > { %v2561_v0 = vadd.f32 %v2560_v46, %v2559_v49  ;;  %v2446_v18 = vadd.f32 %v3474_v27, %v4487_v10  ;;  %v3476_v15 = vadd.f32 %v3443_v44, %v3409_v51  ;;  %v2140_v21 = vpop.f32.mrb[31].mxu1  ;;  %v2566_v17 = vsel %vm2512_vm1, %v2507_v19, 0.0 }
 0x1d7   : > { %v2562_v7 = vsel %vm2512_vm1, %v2505_v35, 0.0  ;;  %v2444_v12 = vadd.f32 %v3475_v26, %v4487_v10  ;;  %v3477_v5 = vadd.f32 %v2367_v42, %v2140_v21 }
 0x1d8   : > { %v2563_v30 = vadd.f32 %v2562_v7, %v2561_v0  ;;  %v2447_v55 = vadd.f32 %v3476_v15, %v4487_v10  ;;  %v2478_v63 = vmul.f32 0.2, %v2446_v18 }
 0x1d9   : > { %v2476_v16 = vmul.f32 0.2, %v2444_v12  ;;  %v2445_v54 = vadd.f32 %v3477_v5, %v4487_v10 }
 0x1da   : > { %v2565_v13 = vadd.f32 %v2564_v23, %v2563_v30  ;;  %v2479_v29 = vmul.f32 0.2, %v2447_v55  ;;  %v2510_v53 = vmax.f32 %v2446_v18, %v2478_v63 }
 0x1db   : > { %v2508_v22 = vmax.f32 %v2444_v12, %v2476_v16  ;;  %v2477_v31 = vmul.f32 0.2, %v2445_v54 }
 0x1dc   : > { %v2567_v8 = vadd.f32 %v2566_v17, %v2565_v13  ;;  %v2511_v9 = vmax.f32 %v2447_v55, %v2479_v29  ;;  %v2572_v42 = vsel %vm2512_vm1, %v2510_v53, 0.0 }
 0x1dd   : > { %v2568_v45 = vsel %vm2512_vm1, %v2508_v22, 0.0  ;;  %v2509_v37 = vmax.f32 %v2445_v54, %v2477_v31 }
 0x1de   : > { %v2569_v44 = vadd.f32 %v2568_v45, %v2567_v8  ;;  %v2574_v10 = vsel %vm2512_vm1, %v2511_v9, 0.0 }
 0x1df   : > { %v2570_v40 = vsel %vm2512_vm1, %v2509_v37, 0.0 }
 0x1e0   : > { %v2571_v58 = vadd.f32 %v2570_v40, %v2569_v44 }
 0x1e2   : > { %v2573_v49 = vadd.f32 %v2572_v42, %v2571_v58 }
 0x1e4   : > { %v2575_v27 = vadd.f32 %v2574_v10, %v2573_v49 }
 0x1e6   : > { %v2576_v24 = vrot.slane %v2575_v27, 4 }
 0x1e8   : > { %v2577_v46 = vadd.f32 %v2576_v24, %v2575_v27 }
 0x1ea   : > { %v2578_v26 = vrot.slane %v2577_v46, 2 }
 0x1ec   : > { %v2579_v51 = vadd.f32 %v2578_v26, %v2577_v46 }
 0x1ee   : > { %v2580_v0 = vrot.slane %v2579_v51, 1 }
 0x1f0   : > { %v2581_v18 = vadd.f32 %v2580_v0, %v2579_v51 }
 0x1f2   : > { %v2582_v15 = vmul.f32 0.00390625, %v2581_v18 }
 0x1f4   : > { %v4636_v21 = vsub.f32 %v4560_v52, %v2582_v15  ;;  %v4639_v7 = vsub.f32 %v4566_v3, %v2582_v15  ;;  %v4642_v12 = vsub.f32 %v4562_v56, %v2582_v15  ;;  %v4645_v5 = vsub.f32 %v4568_v38, %v2582_v15 }
 0x1f5   : > { %v4648_v30 = vsub.f32 %v4580_v41, %v2582_v15  ;;  %v4651_v55 = vsub.f32 %v4586_v4, %v2582_v15  ;;  %v4654_v23 = vsub.f32 %v4582_v62, %v2582_v15  ;;  %v4657_v52 = vsub.f32 %v4589_v57, %v2582_v15 }
 0x1f6   : > { %v4660_v3 = vsub.f32 %v4600_v36, %v2582_v15  ;;  %v4663_v56 = vsub.f32 %v4606_v50, %v2582_v15  ;;  %v4666_v38 = vsub.f32 %v4602_v6, %v2582_v15  ;;  %v4669_v41 = vsub.f32 %v4608_v14, %v2582_v15 }
 0x1f7   : > { %v4672_v4 = vsub.f32 %v4620_v61, %v2582_v15  ;;  %v4674_v62 = vsub.f32 %v2505_v35, %v2582_v15  ;;  %v4676_v63 = vsub.f32 %v2506_v33, %v2582_v15  ;;  %v4678_v57 = vsub.f32 %v2507_v19, %v2582_v15 }
 0x1f8   : > { %v4680_v36 = vsub.f32 %v2508_v22, %v2582_v15  ;;  %v4682_v16 = vsub.f32 %v2509_v37, %v2582_v15  ;;  %v4684_v50 = vsub.f32 %v2510_v53, %v2582_v15  ;;  %v4686_v6 = vsub.f32 %v2511_v9, %v2582_v15 }
 0x1f9   : > { %v4689_v14 = vsub.f32 %v4493_v39, %v2582_v15  ;;  %v4692_v61 = vsub.f32 %v4497_v20, %v2582_v15  ;;  %v4695_v35 = vsub.f32 %v4495_v28, %v2582_v15  ;;  %v4698_v33 = vsub.f32 %v4499_v25, %v2582_v15 }
 0x1fa   : > { %v4705_v13 = vsub.f32 %v4513_v60, %v2582_v15  ;;  %v4710_v20 = vsub.f32 %v4519_v32, %v2582_v15  ;;  %v4717_v29 = vsub.f32 %v4515_v59, %v2582_v15  ;;  %v4723_v32 = vsub.f32 %v4524_v48, %v2582_v15 }
 0x1fb   : > { %v2615_v19 = vmul.f32 %v4689_v14, %v4689_v14  ;;  %v2616_v54 = vmul.f32 %v4692_v61, %v4692_v61  ;;  %v2617_v39 = vmul.f32 %v4695_v35, %v4695_v35  ;;  %v2618_v28 = vmul.f32 %v4698_v33, %v4698_v33 }
 0x1fc   : > { %v2619_v60 = vmul.f32 %v4705_v13, %v4705_v13  ;;  %v2620_v53 = vmul.f32 %v4710_v20, %v4710_v20  ;;  %v4729_v44 = vsub.f32 %v4536_v34, %v2582_v15  ;;  %v2621_v59 = vmul.f32 %v4717_v29, %v4717_v29 }
 0x1fd   : > { %v2647_v25 = vsel %vm2512_vm1, %v2615_v19, 0.0  ;;  %v2648_v17 = vsel %vm2512_vm1, %v2616_v54, 0.0  ;;  %v2650_v31 = vsel %vm2512_vm1, %v2617_v39, 0.0  ;;  %v2652_v45 = vsel %vm2512_vm1, %v2618_v28, 0.0 }
 0x1fe   : > { %v2649_v22 = vadd.f32 %v2648_v17, %v2647_v25  ;;  %v2654_v9 = vsel %vm2512_vm1, %v2619_v60, 0.0  ;;  %v4735_v58 = vsub.f32 %v4543_v43, %v2582_v15  ;;  %v2622_v48 = vmul.f32 %v4723_v32, %v4723_v32 }
 0x1ff   : > { %v2656_v42 = vsel %vm2512_vm1, %v2620_v53, 0.0  ;;  %v4741_v10 = vsub.f32 %v4539_v2, %v2582_v15  ;;  %v2623_v34 = vmul.f32 %v4729_v44, %v4729_v44  ;;  %v2658_v27 = vsel %vm2512_vm1, %v2621_v59, 0.0 }
 0x200   : > { %v2651_v8 = vadd.f32 %v2650_v31, %v2649_v22  ;;  %v4747_v46 = vsub.f32 %v4548_v47, %v2582_v15  ;;  %v2624_v43 = vmul.f32 %v4735_v58, %v4735_v58  ;;  %v2660_v26 = vsel %vm2512_vm1, %v2622_v48, 0.0 }
 0x201   : > { %v2625_v0 = vmul.f32 %v4741_v10, %v4741_v10  ;;  %v2662_v2 = vsel %vm2512_vm1, %v2623_v34, 0.0  ;;  %v2627_v47 = vmul.f32 %v4636_v21, %v4636_v21  ;;  %v2628_v25 = vmul.f32 %v4639_v7, %v4639_v7 }
 0x202   : > { %v2653_v37 = vadd.f32 %v2652_v45, %v2651_v8  ;;  %v2626_v19 = vmul.f32 %v4747_v46, %v4747_v46  ;;  %v2664_v54 = vsel %vm2512_vm1, %v2624_v43, 0.0  ;;  %v2629_v60 = vmul.f32 %v4642_v12, %v4642_v12 }
 0x203   : > { %v2666_v15 = vsel %vm2512_vm1, %v2625_v0, 0.0  ;;  %v2670_v31 = vsel %vm2512_vm1, %v2627_v47, 0.0  ;;  %v2630_v53 = vmul.f32 %v4645_v5, %v4645_v5  ;;  %v2672_v45 = vsel %vm2512_vm1, %v2628_v25, 0.0 }
 0x204   : > { %v2655_v40 = vadd.f32 %v2654_v9, %v2653_v37  ;;  %v2668_v17 = vsel %vm2512_vm1, %v2626_v19, 0.0  ;;  %v2631_v59 = vmul.f32 %v4648_v30, %v4648_v30  ;;  %v2674_v9 = vsel %vm2512_vm1, %v2629_v60, 0.0 }
 0x205   : > { %v2632_v48 = vmul.f32 %v4651_v55, %v4651_v55  ;;  %v2633_v34 = vmul.f32 %v4654_v23, %v4654_v23  ;;  %v2634_v43 = vmul.f32 %v4657_v52, %v4657_v52  ;;  %v2635_v0 = vmul.f32 %v4660_v3, %v4660_v3 }
 0x206   : > { %v2657_v49 = vadd.f32 %v2656_v42, %v2655_v40  ;;  %v2676_v42 = vsel %vm2512_vm1, %v2630_v53, 0.0  ;;  %v2636_v19 = vmul.f32 %v4663_v56, %v4663_v56  ;;  %v2637_v47 = vmul.f32 %v4666_v38, %v4666_v38 }
 0x207   : > { %v2638_v25 = vmul.f32 %v4669_v41, %v4669_v41  ;;  %v2639_v60 = vmul.f32 %v4672_v4, %v4672_v4  ;;  %v2640_v53 = vmul.f32 %v4674_v62, %v4674_v62 }
 0x208   : > { %v2659_v24 = vadd.f32 %v2658_v27, %v2657_v49  ;;  %v2678_v27 = vsel %vm2512_vm1, %v2631_v59, 0.0  ;;  %v2641_v59 = vmul.f32 %v4676_v63, %v4676_v63 }
 0x20a   : > { %v2661_v51 = vadd.f32 %v2660_v26, %v2659_v24  ;;  %v2680_v26 = vsel %vm2512_vm1, %v2632_v48, 0.0  ;;  %v2642_v48 = vmul.f32 %v4678_v57, %v4678_v57 }
 0x20c   : > { %v2663_v18 = vadd.f32 %v2662_v2, %v2661_v51  ;;  %v2682_v2 = vsel %vm2512_vm1, %v2633_v34, 0.0  ;;  %v2643_v34 = vmul.f32 %v4680_v36, %v4680_v36 }
 0x20e   : > { %v2665_v39 = vadd.f32 %v2664_v54, %v2663_v18  ;;  %v2684_v54 = vsel %vm2512_vm1, %v2634_v43, 0.0  ;;  %v2644_v43 = vmul.f32 %v4682_v16, %v4682_v16 }
 0x210   : > { %v2667_v28 = vadd.f32 %v2666_v15, %v2665_v39  ;;  %v2686_v15 = vsel %vm2512_vm1, %v2635_v0, 0.0  ;;  %v2645_v0 = vmul.f32 %v4684_v50, %v4684_v50 }
 0x212   : > { %v2669_v22 = vadd.f32 %v2668_v17, %v2667_v28  ;;  %v2688_v17 = vsel %vm2512_vm1, %v2636_v19, 0.0  ;;  %v2646_v19 = vmul.f32 %v4686_v6, %v4686_v6 }
 0x214   : > { %v2671_v8 = vadd.f32 %v2670_v31, %v2669_v22  ;;  %v2690_v31 = vsel %vm2512_vm1, %v2637_v47, 0.0  ;;  %v2706_v47 = vsel %vm2512_vm1, %v2645_v0, 0.0 }
 0x216   : > { %v2673_v37 = vadd.f32 %v2672_v45, %v2671_v8  ;;  %v2692_v45 = vsel %vm2512_vm1, %v2638_v25, 0.0 }
 0x218   : > { %v2675_v40 = vadd.f32 %v2674_v9, %v2673_v37  ;;  %v2694_v9 = vsel %vm2512_vm1, %v2639_v60, 0.0 }
 0x21a   : > { %v2677_v49 = vadd.f32 %v2676_v42, %v2675_v40  ;;  %v2696_v42 = vsel %vm2512_vm1, %v2640_v53, 0.0 }
 0x21c   : > { %v2679_v24 = vadd.f32 %v2678_v27, %v2677_v49  ;;  %v2698_v27 = vsel %vm2512_vm1, %v2641_v59, 0.0  ;;  %v2722_v59 = vsub.s32 1, %v3633_v1 }
 0x21e   : > { %v2681_v51 = vadd.f32 %v2680_v26, %v2679_v24  ;;  %v2700_v26 = vsel %vm2512_vm1, %v2642_v48, 0.0 }
 0x220   : > { %v2683_v18 = vadd.f32 %v2682_v2, %v2681_v51  ;;  %v2702_v2 = vsel %vm2512_vm1, %v2643_v34, 0.0 }
 0x222   : > { %v2685_v39 = vadd.f32 %v2684_v54, %v2683_v18  ;;  %v2704_v54 = vsel %vm2512_vm1, %v2644_v43, 0.0 }
 0x224   : > { %v2687_v28 = vadd.f32 %v2686_v15, %v2685_v39 }
 0x226   : > { %v2689_v22 = vadd.f32 %v2688_v17, %v2687_v28  ;;  %v2708_v28 = vsel %vm2512_vm1, %v2646_v19, 0.0 }
 0x228   : > { %v2691_v8 = vadd.f32 %v2690_v31, %v2689_v22 }
 0x22a   : > { %v2693_v37 = vadd.f32 %v2692_v45, %v2691_v8 }
 0x22c   : > { %v2695_v40 = vadd.f32 %v2694_v9, %v2693_v37 }
 0x22e   : > { %v2697_v49 = vadd.f32 %v2696_v42, %v2695_v40  ;;  %v2758_v40 = vsub.s32 2, %v3633_v1 }
 0x230   : > { %v2699_v24 = vadd.f32 %v2698_v27, %v2697_v49  ;;  %v4824_v49 = vrot.slane %v4478_v11, %v2758_v40 }
 0x232   : > { %v2701_v51 = vadd.f32 %v2700_v26, %v2699_v24 }
 0x234   : > { %v2703_v18 = vadd.f32 %v2702_v2, %v2701_v51 }
 0x236   : > { %v2705_v39 = vadd.f32 %v2704_v54, %v2703_v18 }
 0x238   : > { %v2707_v15 = vadd.f32 %v2706_v47, %v2705_v39 }
 0x23a   : > { %v2709_v25 = vadd.f32 %v2708_v28, %v2707_v15 }
 0x23c   : > { %v2710_v17 = vrot.slane %v2709_v25, 4 }
 0x23e   : > { %v2711_v22 = vadd.f32 %v2710_v17, %v2709_v25 }
 0x240   : > { %v2712_v60 = vrot.slane %v2711_v22, 2 }
 0x242   : > { %v2713_v31 = vadd.f32 %v2712_v60, %v2711_v22 }
 0x244   : > { %v2714_v8 = vrot.slane %v2713_v31, 1 }
 0x246   : > { %v2715_v53 = vadd.f32 %v2714_v8, %v2713_v31 }
 0x248   : > { %v2716_v45 = vmul.f32 0.00390625, %v2715_v53 }
 0x24a   : > { %v2717_v37 = vadd.f32 1e-05, %v2716_v45 }
 0x24c   : > { %3563 = vrsqrt.f32 %v2717_v37 }
 0x256   : > { %v3564_v9 = vpop.eup %3563 }
 0x257   : > { %v2719_v48 = vmul.f32 %v3564_v9, %v4478_v11 }
 0x259   : > { %v2723_v42 = vrot.slane %v2719_v48, %v2722_v59 }
 0x25b   : > { %v2724_v34 = vmul.f32 %v2723_v42, %v4689_v14  ;;  %v2725_v27 = vmul.f32 %v2723_v42, %v4692_v61  ;;  %v2726_v24 = vmul.f32 %v2723_v42, %v4695_v35  ;;  %v2727_v43 = vmul.f32 %v2723_v42, %v4698_v33 }
 0x25c   : > { %v2728_v26 = vmul.f32 %v2723_v42, %v4705_v13  ;;  %v2729_v51 = vmul.f32 %v2723_v42, %v4710_v20  ;;  %v2730_v1 = vmul.f32 %v2723_v42, %v4717_v29  ;;  %v2731_v0 = vmul.f32 %v2723_v42, %v4723_v32 }
 0x25d   : > { %v2732_v2 = vmul.f32 %v2723_v42, %v4729_v44  ;;  %v2733_v11 = vmul.f32 %v2723_v42, %v4735_v58  ;;  %v2734_v14 = vmul.f32 %v2723_v42, %v4741_v10  ;;  %v2735_v61 = vmul.f32 %v2723_v42, %v4747_v46 }
 0x25e   : > { %v2736_v35 = vmul.f32 %v2723_v42, %v4636_v21  ;;  %v2737_v33 = vmul.f32 %v2723_v42, %v4639_v7  ;;  %v2738_v13 = vmul.f32 %v2723_v42, %v4642_v12  ;;  %v2739_v20 = vmul.f32 %v2723_v42, %v4645_v5 }
 0x25f   : > { %v2740_v29 = vmul.f32 %v2723_v42, %v4648_v30  ;;  %v2741_v32 = vmul.f32 %v2723_v42, %v4651_v55  ;;  %v2742_v44 = vmul.f32 %v2723_v42, %v4654_v23  ;;  %v2743_v58 = vmul.f32 %v2723_v42, %v4657_v52 }
 0x260   : > { %v2744_v10 = vmul.f32 %v2723_v42, %v4660_v3  ;;  %v2745_v46 = vmul.f32 %v2723_v42, %v4663_v56  ;;  %v2746_v21 = vmul.f32 %v2723_v42, %v4666_v38  ;;  %v2747_v7 = vmul.f32 %v2723_v42, %v4669_v41 }
 0x261   : > { %v2748_v12 = vmul.f32 %v2723_v42, %v4672_v4  ;;  %v2749_v5 = vmul.f32 %v2723_v42, %v4674_v62  ;;  %v2750_v30 = vmul.f32 %v2723_v42, %v4676_v63  ;;  %v2751_v55 = vmul.f32 %v2723_v42, %v4678_v57 }
 0x262   : > { %v2752_v23 = vmul.f32 %v2723_v42, %v4680_v36  ;;  %v2753_v52 = vmul.f32 %v2723_v42, %v4682_v16  ;;  %v2754_v3 = vmul.f32 %v2723_v42, %v4684_v50  ;;  %v2755_v56 = vmul.f32 %v2723_v42, %v4686_v6 }
 0x263   : > { %v2760_v38 = vadd.f32 %v4824_v49, %v2724_v34  ;;  %v2761_v41 = vadd.f32 %v4824_v49, %v2725_v27  ;;  %v2762_v4 = vadd.f32 %v4824_v49, %v2726_v24  ;;  %v2763_v62 = vadd.f32 %v4824_v49, %v2727_v43 }
 0x264   : > { %v2764_v63 = vadd.f32 %v4824_v49, %v2728_v26  ;;  %v2765_v57 = vadd.f32 %v4824_v49, %v2729_v51  ;;  %v2766_v36 = vadd.f32 %v4824_v49, %v2730_v1  ;;  %v2767_v16 = vadd.f32 %v4824_v49, %v2731_v0 }
 0x265   : > { %v2768_v50 = vadd.f32 %v4824_v49, %v2732_v2  ;;  %v2769_v6 = vadd.f32 %v4824_v49, %v2733_v11  ;;  %v2770_v18 = vadd.f32 %v4824_v49, %v2734_v14  ;;  %v2771_v19 = vadd.f32 %v4824_v49, %v2735_v61 }
 0x266   : > { %v2772_v54 = vadd.f32 %v4824_v49, %v2736_v35  ;;  %v2773_v39 = vadd.f32 %v4824_v49, %v2737_v33  ;;  %v2774_v47 = vadd.f32 %v4824_v49, %v2738_v13  ;;  %v2775_v15 = vadd.f32 %v4824_v49, %v2739_v20 }
 0x267   : > { %v2776_v28 = vadd.f32 %v4824_v49, %v2740_v29  ;;  %v2777_v25 = vadd.f32 %v4824_v49, %v2741_v32  ;;  %v2778_v17 = vadd.f32 %v4824_v49, %v2742_v44  ;;  %v2779_v22 = vadd.f32 %v4824_v49, %v2743_v58 }
 0x268   : > { %v4880_v60 = vadd.f32 %v4824_v49, %v2744_v10  ;;  %v4883_v31 = vadd.f32 %v4824_v49, %v2745_v46  ;;  %v4886_v8 = vadd.f32 %v4824_v49, %v2746_v21  ;;  %v4889_v53 = vadd.f32 %v4824_v49, %v2747_v7 }
 0x269   : > { %v4892_v45 = vadd.f32 %v4824_v49, %v2748_v12  ;;  %v4895_v37 = vadd.f32 %v4824_v49, %v2749_v5  ;;  %v4898_v59 = vadd.f32 %v4824_v49, %v2750_v30  ;;  %v4901_v9 = vadd.f32 %v4824_v49, %v2751_v55 }
 0x26a   : > { %v4909_v40 = vadd.f32 %v4824_v49, %v2752_v23  ;;  %v4912_v48 = vadd.f32 %v4824_v49, %v2753_v52  ;;  %v4915_v42 = vadd.f32 %v4824_v49, %v2754_v3  ;;  %v4918_v34 = vadd.f32 %v4824_v49, %v2755_v56 }
 0x26b   : > { %v3259_v27 = vpack.c.bf16 %v2760_v38, %v2760_v38  ;;  %v3260_v24 = vpack.c.bf16 %v2761_v41, %v2761_v41  ;;  %v3261_v43 = vpack.c.bf16 %v2762_v4, %v2762_v4  ;;  %v3262_v26 = vpack.c.bf16 %v2763_v62, %v2763_v62 }
 0x26c   : > { %v3263_v51 = vpack.c.bf16 %v2764_v63, %v2764_v63  ;;  %v3264_v1 = vpack.c.bf16 %v2765_v57, %v2765_v57  ;;  %v3265_v0 = vpack.c.bf16 %v2766_v36, %v2766_v36  ;;  %v3266_v2 = vpack.c.bf16 %v2767_v16, %v2767_v16 }
 0x26d   : > { %v3267_v11 = vpack.c.bf16 %v2768_v50, %v2768_v50  ;;  %v3268_v14 = vpack.c.bf16 %v2769_v6, %v2769_v6  ;;  %v3269_v61 = vpack.c.bf16 %v2770_v18, %v2770_v18  ;;  %v3270_v35 = vpack.c.bf16 %v2771_v19, %v2771_v19  ;;  %2921 = vst.msk [vmem:[%s4906_s8] sm:$0xf] %vm2920_vm4, %v3259_v27 }
 0x26e   : > { %2922 = vst.msk [vmem:[%s4906_s8 + $0x4] sm:$0xf] %vm2920_vm4, %v3260_v24  ;;  %2923 = vst.msk [vmem:[%s4906_s8 + $0x8] sm:$0xf] %vm2920_vm4, %v3261_v43  ;;  %v3271_v49 = vpack.c.bf16 %v2772_v54, %v2772_v54  ;;  %v3272_v33 = vpack.c.bf16 %v2773_v39, %v2773_v39  ;;  %v3273_v13 = vpack.c.bf16 %v2774_v47, %v2774_v47 }
 0x26f   : > { %2924 = vst.msk [vmem:[%s4906_s8 + $0xc] sm:$0xf] %vm2920_vm4, %v3262_v26  ;;  %v3274_v20 = vpack.c.bf16 %v2775_v15, %v2775_v15  ;;  %2925 = vst.msk [vmem:[%s4906_s8 + $0x10] sm:$0xf] %vm2920_vm4, %v3263_v51  ;;  %v3275_v29 = vpack.c.bf16 %v2776_v28, %v2776_v28  ;;  %v3276_v32 = vpack.c.bf16 %v2777_v25, %v2777_v25 }
 0x270   : > { %2926 = vst.msk [vmem:[%s4906_s8 + $0x14] sm:$0xf] %vm2920_vm4, %v3264_v1  ;;  %2927 = vst.msk [vmem:[%s4906_s8 + $0x18] sm:$0xf] %vm2920_vm4, %v3265_v0  ;;  %v3277_v44 = vpack.c.bf16 %v2778_v17, %v2778_v17  ;;  %v3278_v58 = vpack.c.bf16 %v2779_v22, %v2779_v22  ;;  %v3279_v10 = vpack.c.bf16 %v4880_v60, %v4880_v60 }
 0x271   : > { %2928 = vst.msk [vmem:[%s4906_s8 + $0x1c] sm:$0xf] %vm2920_vm4, %v3266_v2  ;;  %2929 = vst.msk [vmem:[%s4906_s8 + $0x20] sm:$0xf] %vm2920_vm4, %v3267_v11  ;;  %v3280_v46 = vpack.c.bf16 %v4883_v31, %v4883_v31  ;;  %v3281_v21 = vpack.c.bf16 %v4886_v8, %v4886_v8  ;;  %v3282_v7 = vpack.c.bf16 %v4889_v53, %v4889_v53 }
 0x272   : > { %2930 = vst.msk [vmem:[%s4906_s8 + $0x24] sm:$0xf] %vm2920_vm4, %v3268_v14  ;;  %2931 = vst.msk [vmem:[%s4906_s8 + $0x28] sm:$0xf] %vm2920_vm4, %v3269_v61  ;;  %v3283_v12 = vpack.c.bf16 %v4892_v45, %v4892_v45  ;;  %v3284_v5 = vpack.c.bf16 %v4895_v37, %v4895_v37  ;;  %v3285_v30 = vpack.c.bf16 %v4898_v59, %v4898_v59 }
 0x273   : > { %2932 = vst.msk [vmem:[%s4906_s8 + $0x2c] sm:$0xf] %vm2920_vm4, %v3270_v35  ;;  %2933 = vst.msk [vmem:[%s4906_s8 + $0x30] sm:$0xf] %vm2920_vm4, %v3271_v49  ;;  %v3286_v55 = vpack.c.bf16 %v4901_v9, %v4901_v9  ;;  %v3287_v23 = vpack.c.bf16 %v4909_v40, %v4909_v40  ;;  %v3288_v52 = vpack.c.bf16 %v4912_v48, %v4912_v48 }
 0x274   : > { %2934 = vst.msk [vmem:[%s4906_s8 + $0x34] sm:$0xf] %vm2920_vm4, %v3272_v33  ;;  %2935 = vst.msk [vmem:[%s4906_s8 + $0x38] sm:$0xf] %vm2920_vm4, %v3273_v13  ;;  %v3289_v3 = vpack.c.bf16 %v4915_v42, %v4915_v42  ;;  %v3290_v56 = vpack.c.bf16 %v4918_v34, %v4918_v34 }
 0x275   : > { %2936 = vst.msk [vmem:[%s4906_s8 + $0x3c] sm:$0xf] %vm2920_vm4, %v3274_v20  ;;  %2937 = vst.msk [vmem:[%s4906_s8 + $0x40] sm:$0xf] %vm2920_vm4, %v3275_v29 }
 0x276   : > { %2938 = vst.msk [vmem:[%s4906_s8 + $0x44] sm:$0xf] %vm2920_vm4, %v3276_v32  ;;  %2939 = vst.msk [vmem:[%s4906_s8 + $0x48] sm:$0xf] %vm2920_vm4, %v3277_v44 }
 0x277   : > { %2940 = vst.msk [vmem:[%s4906_s8 + $0x4c] sm:$0xf] %vm2920_vm4, %v3278_v58  ;;  %2941 = vst.msk [vmem:[%s4906_s8 + $0x50] sm:$0xf] %vm2920_vm4, %v3279_v10 }
 0x278   : > { %2942 = vst.msk [vmem:[%s4906_s8 + $0x54] sm:$0xf] %vm2920_vm4, %v3280_v46  ;;  %2943 = vst.msk [vmem:[%s4906_s8 + $0x58] sm:$0xf] %vm2920_vm4, %v3281_v21 }
 0x279   : > { %2944 = vst.msk [vmem:[%s4906_s8 + $0x5c] sm:$0xf] %vm2920_vm4, %v3282_v7  ;;  %2945 = vst.msk [vmem:[%s4906_s8 + $0x60] sm:$0xf] %vm2920_vm4, %v3283_v12 }
 0x27a   : > { %2946 = vst.msk [vmem:[%s4906_s8 + $0x64] sm:$0xf] %vm2920_vm4, %v3284_v5  ;;  %2947 = vst.msk [vmem:[%s4906_s8 + $0x68] sm:$0xf] %vm2920_vm4, %v3285_v30 }
 0x27b   : > { %2948 = vst.msk [vmem:[%s4906_s8 + $0x6c] sm:$0xf] %vm2920_vm4, %v3286_v55  ;;  %2949 = vst.msk [vmem:[%s4906_s8 + $0x70] sm:$0xf] %vm2920_vm4, %v3287_v23 }
 0x27c   : > { %2950 = vst.msk [vmem:[%s4906_s8 + $0x74] sm:$0xf] %vm2920_vm4, %v3288_v52  ;;  %2951 = vst.msk [vmem:[%s4906_s8 + $0x78] sm:$0xf] %vm2920_vm4, %v3289_v3 }
 0x27d   : > { %2952 = vst.msk [vmem:[%s4906_s8 + $0x7c] sm:$0xf] %vm2920_vm4, %v3290_v56 }
 0x27e PF: > { %s13_s14 = sadd.s32 1, %s3587_s14   ;;  %s5134_s12 = smov %s3583_s13 }
 0x27f   : > { %p10_p5 = scmp.ge.s32.totalorder %s13_s14, 4   ;;  %s5135_s13 = smov %s5137_s15 }
 0x281   :  { %12 = sbr.rel (!%p10_p5) target bundleno = 2 (0x2), region = 70 }

</bundles_post_ra>
